<compile_context>
chip_gen: v7x
topology: tpu7x:2x2x1
jax: 0.10.0
libtpu: 0.0.40
codegen_flags: <defaults>
</compile_context>

<pallas_src>
import functools

import jax
import jax.numpy as jnp
from jax.experimental import pallas as pl
from jax.experimental.pallas import tpu as pltpu


# --------------------------------------------------------------------------
# Small helpers
# --------------------------------------------------------------------------
def _round_up(x, m):
    return ((x + m - 1) // m) * m


def _padded_bytes(shape, itemsize):
    """Approximate VMEM footprint of one block (last two dims tile to (8,128))."""
    dims = list(shape)
    if len(dims) >= 2:
        dims[-1] = _round_up(dims[-1], 128)
        dims[-2] = _round_up(dims[-2], 8)
    else:
        dims[-1] = _round_up(dims[-1], 128)
    n = 1
    for d in dims:
        n *= int(d)
    return n * itemsize


def _vmem_limit(nbytes, floor=16 << 20, cap=64 << 20):
    """Scoped-VMEM budget: 1.5x estimated need + slack, floored at the old
    default, capped at v7x's 64 MiB per TensorCore."""
    return int(min(max(int(nbytes * 1.5) + (2 << 20), floor), cap))


@functools.lru_cache(maxsize=None)
def _buffered_one_supported():
    """Probe whether pipeline_mode=pl.Buffered(1) (single-buffered resident
    blocks) is supported; fall back to default double-buffering otherwise."""
    try:
        def _copy(x_ref, o_ref):
            o_ref[...] = x_ref[...]

        spec = pl.BlockSpec((8, 128), lambda i: (0, 0),
                            pipeline_mode=pl.Buffered(1))
        out = pl.pallas_call(
            _copy,
            out_shape=jax.ShapeDtypeStruct((8, 128), jnp.float32),
            grid_spec=pltpu.PrefetchScalarGridSpec(
                num_scalar_prefetch=0, grid=(1,),
                in_specs=[spec],
                out_specs=pl.BlockSpec((8, 128), lambda i: (0, 0))),
        )(jnp.zeros((8, 128), jnp.float32))
        jax.block_until_ready(out)
        return True
    except Exception:
        return False


def _resident_spec(block_shape, index_map):
    """BlockSpec for blocks whose index never changes (weights / biases):
    single buffer instead of the default two -> VMEM headroom at large H."""
    if _buffered_one_supported():
        return pl.BlockSpec(block_shape, index_map, pipeline_mode=pl.Buffered(1))
    return pl.BlockSpec(block_shape, index_map)


@functools.lru_cache(maxsize=None)
def _num_tensorcores():
    """2 on v7x-class chips (2 TC/chip), 1 on v5e/v6e. Conservative default 1."""
    try:
        kind = jax.devices()[0].device_kind.lower()
        return 2 if "v7" in kind else 1
    except Exception:
        return 1


# --------------------------------------------------------------------------
# Tiling heuristics
# --------------------------------------------------------------------------
def _pick_batch_block(B):
    """Split the batch across TensorCores only on multi-TC chips AND when each
    half fills a full 256-row MXU tile.  On single-TC chips (v5e/v6e) a split
    just serializes two half-batch recurrences (~2x slower Phase 2)."""
    if _num_tensorcores() >= 2 and B % 2 == 0 and B // 2 >= 256:
        return B // 2
    return B


def _pick_row_block(rows, target=512):
    """Phase-1 row tile: fixed ~512-row target (>=85% of HBM roofline); the
    wrapper pads rows up to a multiple of the tile (no divisor hunting)."""
    if rows >= target:
        return target
    return _round_up(max(rows, 8), 8)


def _pick_time_chunk(T, B, G, gx_itemsize, max_chunk=32, chunk_byte_cap=8 << 20):
    """Timesteps per Phase-2 grid step.  Larger chunks amortize the ~0.35us
    grid-step overhead and keep the gates_x stream ahead of compute; the byte
    cap keeps the double-buffered (TT, B, 4H) chunk VMEM-friendly on v7x."""
    row_bytes = max(B, 8) * max(G, 128) * gx_itemsize
    cap = max(1, min(max_chunk, chunk_byte_cap // max(row_bytes, 1)))
    tt = min(T, cap)
    for d in range(tt, 0, -1):            # prefer an exact divisor near the cap
        if T % d == 0:
            if 2 * d >= tt:
                return d
            break
    return tt                              # ragged tail handled in-kernel


# --------------------------------------------------------------------------
# Phase 1: time-parallel input projection  (x @ W_ih^T + combined bias)
# --------------------------------------------------------------------------
def _input_proj_kernel(x_ref, wih_ref, b_ref, gx_ref):
    gx_ref[...] = (
        jnp.dot(x_ref[...], wih_ref[...], preferred_element_type=jnp.float32)
        + b_ref[...]
    ).astype(gx_ref.dtype)


# --------------------------------------------------------------------------
# Phase 2: sequential recurrence + fused final fc
# --------------------------------------------------------------------------
def _lstm_recurrent_kernel(gx_ref, whh_ref, wfc_ref, bfc_ref, out_ref,
                           h_scr, c_scr, *, t_total):
    tc = pl.program_id(1)                      # time-chunk index ("arbitrary")
    BB, H = h_scr.shape
    TT = gx_ref.shape[0]
    G = 4 * H
    mm_dtype = whh_ref.dtype
    ragged = (t_total % TT) != 0

    # Zero-init hidden/cell state at the first time-chunk of each batch tile
    # (matches torch.zeros h0/c0).
    @pl.when(tc == 0)
    def _():
        h_scr[...] = jnp.zeros_like(h_scr)
        c_scr[...] = jnp.zeros_like(c_scr)

    if H % 128 != 0:
        # Lane mask selecting the "g" gate region (PyTorch gate order i,f,g,o);
        # hoisted out of the unrolled loop.
        lane = jax.lax.broadcasted_iota(jnp.int32, (BB, G), 1)
        g_mask = (lane >= 2 * H) & (lane < 3 * H)

    def cell(i):
        # gx already contains x_t @ W_ih^T + (b_ih + b_hh); upcast is free.
        gates = gx_ref[i].astype(jnp.float32) + jnp.dot(
            h_scr[...].astype(mm_dtype), whh_ref[...],
            preferred_element_type=jnp.float32)
        if H % 128 == 0:
            # Lane-aligned slices: sigmoid only on i/f/o, tanh only on g
            # (5H transcendentals instead of 8H).
            i_g = jax.nn.sigmoid(gates[:, 0 * H:1 * H])
            f_g = jax.nn.sigmoid(gates[:, 1 * H:2 * H])
            g_g = jnp.tanh(gates[:, 2 * H:3 * H])
            o_g = jax.nn.sigmoid(gates[:, 3 * H:4 * H])
        else:
            # H < 128: keep full-vreg EUP ops + a VPU select (avoids
            # partial-lane slices on the EUP).
            sig = jax.nn.sigmoid(gates)
            tnh = jnp.tanh(gates)
            act = jnp.where(g_mask, tnh, sig)
            i_g = act[:, 0 * H:1 * H]
            f_g = act[:, 1 * H:2 * H]
            g_g = act[:, 2 * H:3 * H]
            o_g = act[:, 3 * H:4 * H]
        c_new = f_g * c_scr[...] + i_g * g_g
        c_scr[...] = c_new
        h_scr[...] = o_g * jnp.tanh(c_new)

    if ragged:
        n_valid = jnp.minimum(TT, t_total - tc * TT)

        def step(i, carry):
            @pl.when(i < n_valid)
            def _():
                cell(i)
            return carry
    else:
        def step(i, carry):
            cell(i)
            return carry

    jax.lax.fori_loop(0, TT, step, 0, unroll=True)

    # Final fc on h_T, written once on the last time-chunk.
    @pl.when(tc == pl.num_programs(1) - 1)
    def _():
        out = (jnp.dot(h_scr[...].astype(wfc_ref.dtype), wfc_ref[...],
                       preferred_element_type=jnp.float32)
               + bfc_ref[...])
        out_ref[...] = out.astype(out_ref.dtype)


# --------------------------------------------------------------------------
# Wrapper
# --------------------------------------------------------------------------
def lstm_forward(x, params, *, matmul_dtype=jnp.bfloat16, time_chunk=None):
    """x: (B, T, input_size) batch_first (PyTorch convention). Returns (B, O).

    matmul_dtype is the dtype of the MXU operands and of the gates_x
    intermediate (bf16 default: 2-3x MXU throughput + half the HBM/VMEM
    traffic on all TPU generations; accumulation and gate/h/c math stay f32).
    Pass jnp.float32 for exact parity with an f32 reference.
    """
    w_ih, w_hh, b_ih, b_hh, w_fc, b_fc = (
        params["w_ih"], params["w_hh"], params["b_ih"],
        params["b_hh"], params["w_fc"], params["b_fc"])

    B, T, I = x.shape
    H = w_hh.shape[1]          # w_hh: (4H, H)
    O = w_fc.shape[0]          # w_fc: (O, H)
    G = 4 * H

    mmdt = jnp.dtype(matmul_dtype)
    gx_dtype = mmdt            # bf16 gates_x halves the dominant HBM round trip
    mm_sz = mmdt.itemsize
    gx_sz = jnp.dtype(gx_dtype).itemsize
    out_sz = jnp.dtype(x.dtype).itemsize

    TT = (_pick_time_chunk(T, B, G, gx_sz) if time_chunk is None
          else max(1, min(time_chunk, T)))
    BB = _pick_batch_block(B)
    n_b, n_tc = B // BB, pl.cdiv(T, TT)

    # Weights pre-transposed so every matmul is (M,K)@(K,N); biases combined.
    wih_t = jnp.transpose(w_ih).astype(mmdt)                  # (I, 4H)
    whh_t = jnp.transpose(w_hh).astype(mmdt)                  # (H, 4H)
    bias = (b_ih + b_hh).reshape(1, G).astype(jnp.float32)    # (1, 4H)
    wfc_t = jnp.transpose(w_fc).astype(mmdt)                  # (H, O)
    bfc = b_fc.reshape(1, O).astype(jnp.float32)              # (1, O)

    # ---- Phase 1: one big time-parallel matmul over all T*B rows ----------
    # TODO(synk): the (B,T,I)->(T,B,I) transpose could be folded into the
    # Phase-1 out index_map (read batch-major, write time-major) to save one
    # HBM pass over x; low priority unless I ~ 4H.
    rows = T * B
    R = _pick_row_block(rows)
    rows_pad = pl.cdiv(rows, R) * R
    x_flat = jnp.transpose(x, (1, 0, 2)).reshape(rows, I).astype(mmdt)
    if rows_pad != rows:
        x_flat = jnp.pad(x_flat, ((0, rows_pad - rows), (0, 0)))

    p1_vmem = _vmem_limit(
        2 * _padded_bytes((R, I), mm_sz)        # x tile (double buffered)
        + 2 * _padded_bytes((R, G), gx_sz)      # gx tile (double buffered)
        + _padded_bytes((I, G), mm_sz)          # W_ih^T (resident)
        + _padded_bytes((1, G), 4))             # bias

    gx_flat = pl.pallas_call(
        _input_proj_kernel,
        out_shape=jax.ShapeDtypeStruct((rows_pad, G), gx_dtype),
        grid_spec=pltpu.PrefetchScalarGridSpec(
            num_scalar_prefetch=0,
            grid=(rows_pad // R,),
            in_specs=[
                pl.BlockSpec((R, I), lambda r: (r, 0)),
                _resident_spec((I, G), lambda r: (0, 0)),
                _resident_spec((1, G), lambda r: (0, 0)),
            ],
            out_specs=pl.BlockSpec((R, G), lambda r: (r, 0)),
        ),
        compiler_params=pltpu.CompilerParams(
            dimension_semantics=("parallel",),
            vmem_limit_bytes=p1_vmem),
        cost_estimate=pl.CostEstimate(
            flops=2 * rows_pad * I * G,
            transcendentals=0,
            bytes_accessed=mm_sz * (rows_pad * I + I * G) + 4 * G
                           + gx_sz * rows_pad * G),
    )(x_flat, wih_t, bias)

    gates_x = gx_flat[:rows].reshape(T, B, G)                  # (T, B, 4H)

    # ---- Phase 2: sequential recurrence (+ fused fc on last chunk) --------
    p2_vmem = _vmem_limit(
        2 * _padded_bytes((TT, BB, G), gx_sz)   # gx chunk (double buffered)
        + _padded_bytes((H, G), mm_sz)          # W_hh^T (resident)
        + _padded_bytes((H, O), mm_sz)          # W_fc^T (resident)
        + _padded_bytes((1, O), 4)              # b_fc
        + 2 * _padded_bytes((BB, O), out_sz)    # out (double buffered)
        + 2 * _padded_bytes((BB, H), 4))        # h/c scratch

    kernel = functools.partial(_lstm_recurrent_kernel, t_total=T)
    out = pl.pallas_call(
        kernel,
        out_shape=jax.ShapeDtypeStruct((B, O), x.dtype),
        grid_spec=pltpu.PrefetchScalarGridSpec(
            num_scalar_prefetch=0,
            grid=(n_b, n_tc),
            in_specs=[
                pl.BlockSpec((TT, BB, G), lambda b, t: (t, b, 0)),  # gates chunk
                _resident_spec((H, G), lambda b, t: (0, 0)),        # W_hh^T
                _resident_spec((H, O), lambda b, t: (0, 0)),        # W_fc^T
                _resident_spec((1, O), lambda b, t: (0, 0)),        # b_fc
            ],
            out_specs=pl.BlockSpec((BB, O), lambda b, t: (b, 0)),
            scratch_shapes=[
                pltpu.VMEM((BB, H), jnp.float32),                   # h state
                pltpu.VMEM((BB, H), jnp.float32),                   # c state
            ],
        ),
        compiler_params=pltpu.CompilerParams(
            dimension_semantics=("parallel", "arbitrary"),
            vmem_limit_bytes=p2_vmem),
        cost_estimate=pl.CostEstimate(
            flops=2 * T * B * H * G + 2 * B * H * O,
            transcendentals=T * B * 6 * H,
            bytes_accessed=gx_sz * T * B * G + mm_sz * (H * G + H * O)
                           + 4 * O + out_sz * B * O),
    )(gates_x, whh_t, wfc_t, bfc)
    return out


# --------------------------------------------------------------------------
# Pure-JAX reference (mirrors torch.nn.LSTM(batch_first=True) + Linear)
# --------------------------------------------------------------------------
def lstm_reference(x, params):
    w_ih, w_hh, b_ih, b_hh, w_fc, b_fc = (
        params["w_ih"], params["w_hh"], params["b_ih"],
        params["b_hh"], params["w_fc"], params["b_fc"])
    B, T, I = x.shape
    H = w_hh.shape[1]
    h = jnp.zeros((B, H), jnp.float32)
    c = jnp.zeros((B, H), jnp.float32)
    for t in range(T):
        gates = x[:, t, :] @ w_ih.T + h @ w_hh.T + b_ih + b_hh
        i_g = jax.nn.sigmoid(gates[:, 0 * H:1 * H])
        f_g = jax.nn.sigmoid(gates[:, 1 * H:2 * H])
        g_g = jnp.tanh(gates[:, 2 * H:3 * H])
        o_g = jax.nn.sigmoid(gates[:, 3 * H:4 * H])
        c = f_g * c + i_g * g_g
        h = o_g * jnp.tanh(c)
    return h @ w_fc.T + b_fc


def init_params(key, input_size, hidden_size, output_size):
    """Deterministic init matching PyTorch's U(-1/sqrt(H), 1/sqrt(H)) shapes."""
    ks = jax.random.split(key, 6)
    k_lstm = 1.0 / jnp.sqrt(hidden_size)
    k_fc = 1.0 / jnp.sqrt(hidden_size)
    u = lambda k, shape, s: jax.random.uniform(k, shape, jnp.float32, -s, s)
    return {
        "w_ih": u(ks[0], (4 * hidden_size, input_size), k_lstm),
        "w_hh": u(ks[1], (4 * hidden_size, hidden_size), k_lstm),
        "b_ih": u(ks[2], (4 * hidden_size,), k_lstm),
        "b_hh": u(ks[3], (4 * hidden_size,), k_lstm),
        "w_fc": u(ks[4], (output_size, hidden_size), k_fc),
        "b_fc": u(ks[5], (output_size,), k_fc),
    }


if __name__ == "__main__":
    # Config 1: small shapes, exercises the H<128 lane-mask gate path.
    B, T, INPUT, HIDDEN, OUTPUT = 2, 8, 16, 32, 8

    key = jax.random.PRNGKey(0)
    k_x, k_p = jax.random.split(key)
    x = jax.random.normal(k_x, (B, T, INPUT), jnp.float32)
    params = init_params(k_p, INPUT, HIDDEN, OUTPUT)
    ref = lstm_reference(x, params)

    # Default path: bf16 MXU operands / bf16 gates_x (f32 accumulation/state).
    out_bf16 = jax.block_until_ready(jax.jit(lstm_forward)(x, params))
    assert out_bf16.shape == (B, OUTPUT)
    assert jnp.allclose(out_bf16, ref, atol=5e-2, rtol=5e-2), (
        f"bf16 mismatch: max abs err {jnp.max(jnp.abs(out_bf16 - ref))}")

    # Exact-parity path: f32 MXU operands.
    fwd_f32 = jax.jit(functools.partial(lstm_forward, matmul_dtype=jnp.float32))
    out_f32 = jax.block_until_ready(fwd_f32(x, params))
    assert jnp.allclose(out_f32, ref, atol=1e-4, rtol=1e-4), (
        f"f32 mismatch: max abs err {jnp.max(jnp.abs(out_f32 - ref))}")

    # Config 2: exercises the lane-aligned gate-slicing path (H % 128 == 0)
    # and the padded Phase-1 row tile (rows not a multiple of 8).
    B2, T2, I2, H2, O2 = 2, 6, 8, 128, 16
    x2 = jax.random.normal(jax.random.PRNGKey(1), (B2, T2, I2), jnp.float32)
    p2 = init_params(jax.random.PRNGKey(2), I2, H2, O2)
    ref2 = lstm_reference(x2, p2)
    out2 = jax.block_until_ready(
        jax.jit(functools.partial(lstm_forward, matmul_dtype=jnp.float32))(x2, p2))
    assert jnp.allclose(out2, ref2, atol=1e-4, rtol=1e-4), (
        f"f32 H=128 mismatch: max abs err {jnp.max(jnp.abs(out2 - ref2))}")

    print("KERNEL_OK")
</pallas_src>

<mosaic_0001>
module attributes {stable_mosaic.version = 11 : i64} {
  func.func @_input_proj_kernel(%arg0: i32, %arg1: memref<16x16xbf16, #tpu.memory_space<vmem>>, %arg2: memref<16x128xbf16, #tpu.memory_space<vmem>>, %arg3: memref<1x128xf32, #tpu.memory_space<vmem>>, %arg4: memref<16x128xbf16, #tpu.memory_space<vmem>>) attributes {dimension_semantics = [#tpu.dimension_semantics<parallel>], iteration_bounds = array<i64: 1>, scalar_prefetch = 0 : i64, scratch_operands = 0 : i64, tpu.core_type = #tpu.core_type<tc>, window_params = [{transform_indices = @transform_0, window_bounds = array<i64: 16, 16>}, {pipeline_mode = #tpu.pipeline_mode<synchronous>, transform_indices = @transform_1, window_bounds = array<i64: 16, 128>}, {pipeline_mode = #tpu.pipeline_mode<synchronous>, transform_indices = @transform_2, window_bounds = array<i64: 1, 128>}, {transform_indices = @transform_3, window_bounds = array<i64: 16, 128>}]} {
    %c0 = arith.constant 0 : index
    %c0_0 = arith.constant 0 : index
    %0 = vector.load %arg1[%c0, %c0_0] : memref<16x16xbf16, #tpu.memory_space<vmem>>, vector<16x16xbf16>
    %c0_1 = arith.constant 0 : index
    %c0_2 = arith.constant 0 : index
    %1 = vector.load %arg2[%c0_1, %c0_2] : memref<16x128xbf16, #tpu.memory_space<vmem>>, vector<16x128xbf16>
    %cst = arith.constant dense<0.000000e+00> : vector<16x128xf32>
    %2 = tpu.matmul %0, %1, %cst {dimension_numbers = #tpu.dot_dimension_numbers<[1], [0], [0], [1], [0, 0, 1, 1], [], []>} : vector<16x16xbf16>, vector<16x128xbf16>, vector<16x128xf32> -> vector<16x128xf32>
    %c0_3 = arith.constant 0 : index
    %c0_4 = arith.constant 0 : index
    %3 = vector.load %arg3[%c0_3, %c0_4] : memref<1x128xf32, #tpu.memory_space<vmem>>, vector<1x128xf32>
    %4 = vector.broadcast %3 : vector<1x128xf32> to vector<16x128xf32>
    %5 = arith.addf %2, %4 : vector<16x128xf32>
    %6 = arith.truncf %5 : vector<16x128xf32> to vector<16x128xbf16>
    %c0_5 = arith.constant 0 : index
    %c0_6 = arith.constant 0 : index
    %7 = vector.load %arg4[%c0_5, %c0_6] : memref<16x128xbf16, #tpu.memory_space<vmem>>, vector<16x128xbf16>
    tpu.vector_store %arg4[%c0_5, %c0_6], %6 {strides = array<i32>} : memref<16x128xbf16, #tpu.memory_space<vmem>>, vector<16x128xbf16>,
    return
  }
  func.func @transform_0(%arg0: i32) -> (i32, i32) {
    %c0_i32 = arith.constant 0 : i32
    %c0_i32_0 = arith.constant 0 : i32
    return %arg0, %c0_i32 : i32, i32
  }
  func.func @transform_1(%arg0: i32) -> (i32, i32) {
    %c0_i32 = arith.constant 0 : i32
    %c0_i32_0 = arith.constant 0 : i32
    %c0_i32_1 = arith.constant 0 : i32
    return %c0_i32, %c0_i32_0 : i32, i32
  }
  func.func @transform_2(%arg0: i32) -> (i32, i32) {
    %c0_i32 = arith.constant 0 : i32
    %c0_i32_0 = arith.constant 0 : i32
    %c0_i32_1 = arith.constant 0 : i32
    return %c0_i32, %c0_i32_0 : i32, i32
  }
  func.func @transform_3(%arg0: i32) -> (i32, i32) {
    %c0_i32 = arith.constant 0 : i32
    %c0_i32_0 = arith.constant 0 : i32
    return %arg0, %c0_i32 : i32, i32
  }
}

module attributes {stable_mosaic.version = 11 : i64} {
  func.func @_lstm_recurrent_kernel(%arg0: i32, %arg1: i32, %arg2: memref<8x2x128xbf16, #tpu.memory_space<vmem>>, %arg3: memref<32x128xbf16, #tpu.memory_space<vmem>>, %arg4: memref<32x8xbf16, #tpu.memory_space<vmem>>, %arg5: memref<1x8xf32, #tpu.memory_space<vmem>>, %arg6: memref<2x8xf32, #tpu.memory_space<vmem>>, %arg7: memref<2x32xf32, #tpu.memory_space<vmem>>, %arg8: memref<2x32xf32, #tpu.memory_space<vmem>>) attributes {dimension_semantics = [#tpu.dimension_semantics<parallel>, #tpu.dimension_semantics<arbitrary>], iteration_bounds = array<i64: 1, 1>, scalar_prefetch = 0 : i64, scratch_operands = 2 : i64, tpu.core_type = #tpu.core_type<tc>, window_params = [{transform_indices = @transform_0, window_bounds = array<i64: 8, 2, 128>}, {pipeline_mode = #tpu.pipeline_mode<synchronous>, transform_indices = @transform_1, window_bounds = array<i64: 32, 128>}, {pipeline_mode = #tpu.pipeline_mode<synchronous>, transform_indices = @transform_2, window_bounds = array<i64: 32, 8>}, {pipeline_mode = #tpu.pipeline_mode<synchronous>, transform_indices = @transform_3, window_bounds = array<i64: 1, 8>}, {transform_indices = @transform_4, window_bounds = array<i64: 2, 8>}]} {
    %c0_i32 = arith.constant 0 : i32
    %0 = arith.cmpi eq, %arg1, %c0_i32 : i32
    %1 = arith.extui %0 : i1 to i32
    %c0_i32_0 = arith.constant 0 : i32
    %2 = arith.cmpi ne, %1, %c0_i32_0 : i32
    scf.if %2 {
      %cst_114 = arith.constant 0.000000e+00 : f32
      %236 = vector.broadcast %cst_114 : f32 to vector<2x32xf32>
      %c0_115 = arith.constant 0 : index
      %c0_116 = arith.constant 0 : index
      %237 = vector.load %arg7[%c0_115, %c0_116] : memref<2x32xf32, #tpu.memory_space<vmem>>, vector<2x32xf32>
      tpu.vector_store %arg7[%c0_115, %c0_116], %236 {strides = array<i32>} : memref<2x32xf32, #tpu.memory_space<vmem>>, vector<2x32xf32>,
      %cst_117 = arith.constant 0.000000e+00 : f32
      %238 = vector.broadcast %cst_117 : f32 to vector<2x32xf32>
      %c0_118 = arith.constant 0 : index
      %c0_119 = arith.constant 0 : index
      %239 = vector.load %arg8[%c0_118, %c0_119] : memref<2x32xf32, #tpu.memory_space<vmem>>, vector<2x32xf32>
      tpu.vector_store %arg8[%c0_118, %c0_119], %238 {strides = array<i32>} : memref<2x32xf32, #tpu.memory_space<vmem>>, vector<2x32xf32>,
    } else {
    }
    %3 = tpu.iota {dimensions = array<i32: 1>} : vector<2x128xi32>
    %c64_i32 = arith.constant 64 : i32
    %4 = vector.broadcast %c64_i32 : i32 to vector<2x128xi32>
    %5 = arith.cmpi sge, %3, %4 : vector<2x128xi32>
    %c96_i32 = arith.constant 96 : i32
    %6 = vector.broadcast %c96_i32 : i32 to vector<2x128xi32>
    %7 = arith.cmpi slt, %3, %6 : vector<2x128xi32>
    %8 = arith.andi %5, %7 : vector<2x128xi1>
    %c0_i32_1 = arith.constant 0 : i32
    %9 = arith.index_cast %c0_i32_1 : i32 to index
    %c0 = arith.constant 0 : index
    %c0_2 = arith.constant 0 : index
    %10 = vector.load %arg2[%9, %c0, %c0_2] : memref<8x2x128xbf16, #tpu.memory_space<vmem>>, vector<1x2x128xbf16>
    %11 = vector.shape_cast %10 : vector<1x2x128xbf16> to vector<2x128xbf16>
    %12 = arith.extf %11 : vector<2x128xbf16> to vector<2x128xf32>
    %c0_3 = arith.constant 0 : index
    %c0_4 = arith.constant 0 : index
    %13 = vector.load %arg7[%c0_3, %c0_4] : memref<2x32xf32, #tpu.memory_space<vmem>>, vector<2x32xf32>
    %14 = arith.truncf %13 : vector<2x32xf32> to vector<2x32xbf16>
    %c0_5 = arith.constant 0 : index
    %c0_6 = arith.constant 0 : index
    %15 = vector.load %arg3[%c0_5, %c0_6] : memref<32x128xbf16, #tpu.memory_space<vmem>>, vector<32x128xbf16>
    %cst = arith.constant dense<0.000000e+00> : vector<2x128xf32>
    %16 = tpu.matmul %14, %15, %cst {dimension_numbers = #tpu.dot_dimension_numbers<[1], [0], [0], [1], [0, 0, 1, 1], [], []>} : vector<2x32xbf16>, vector<32x128xbf16>, vector<2x128xf32> -> vector<2x128xf32>
    %17 = arith.addf %12, %16 : vector<2x128xf32>
    %18 = arith.negf %17 : vector<2x128xf32>
    %19 = math.exp %18 : vector<2x128xf32>
    %cst_7 = arith.constant 1.000000e+00 : f32
    %20 = vector.broadcast %cst_7 : f32 to vector<2x128xf32>
    %21 = arith.addf %20, %19 : vector<2x128xf32>
    %22 = arith.divf %20, %21 : vector<2x128xf32>
    %23 = math.tanh %17 : vector<2x128xf32>
    %24 = arith.select %8, %23, %22 : vector<2x128xi1>, vector<2x128xf32>
    %25 = vector.extract_strided_slice %24 {offsets = [0, 0], sizes = [2, 32], strides = [1, 1]} : vector<2x128xf32> to vector<2x32xf32>
    %26 = vector.extract_strided_slice %24 {offsets = [0, 32], sizes = [2, 32], strides = [1, 1]} : vector<2x128xf32> to vector<2x32xf32>
    %27 = vector.extract_strided_slice %24 {offsets = [0, 64], sizes = [2, 32], strides = [1, 1]} : vector<2x128xf32> to vector<2x32xf32>
    %28 = vector.extract_strided_slice %24 {offsets = [0, 96], sizes = [2, 32], strides = [1, 1]} : vector<2x128xf32> to vector<2x32xf32>
    %c0_8 = arith.constant 0 : index
    %c0_9 = arith.constant 0 : index
    %29 = vector.load %arg8[%c0_8, %c0_9] : memref<2x32xf32, #tpu.memory_space<vmem>>, vector<2x32xf32>
    %30 = arith.mulf %26, %29 : vector<2x32xf32>
    %31 = arith.mulf %25, %27 : vector<2x32xf32>
    %32 = arith.addf %30, %31 : vector<2x32xf32>
    %c0_10 = arith.constant 0 : index
    %c0_11 = arith.constant 0 : index
    %33 = vector.load %arg8[%c0_10, %c0_11] : memref<2x32xf32, #tpu.memory_space<vmem>>, vector<2x32xf32>
    tpu.vector_store %arg8[%c0_10, %c0_11], %32 {strides = array<i32>} : memref<2x32xf32, #tpu.memory_space<vmem>>, vector<2x32xf32>,
    %34 = math.tanh %32 : vector<2x32xf32>
    %35 = arith.mulf %28, %34 : vector<2x32xf32>
    %c0_12 = arith.constant 0 : index
    %c0_13 = arith.constant 0 : index
    %36 = vector.load %arg7[%c0_12, %c0_13] : memref<2x32xf32, #tpu.memory_space<vmem>>, vector<2x32xf32>
    tpu.vector_store %arg7[%c0_12, %c0_13], %35 {strides = array<i32>} : memref<2x32xf32, #tpu.memory_space<vmem>>, vector<2x32xf32>,
    %c1_i32 = arith.constant 1 : i32
    %37 = arith.index_cast %c1_i32 : i32 to index
    %c0_14 = arith.constant 0 : index
    %c0_15 = arith.constant 0 : index
    %38 = vector.load %arg2[%37, %c0_14, %c0_15] : memref<8x2x128xbf16, #tpu.memory_space<vmem>>, vector<1x2x128xbf16>
    %39 = vector.shape_cast %38 : vector<1x2x128xbf16> to vector<2x128xbf16>
    %40 = arith.extf %39 : vector<2x128xbf16> to vector<2x128xf32>
    %c0_16 = arith.constant 0 : index
    %c0_17 = arith.constant 0 : index
    %41 = vector.load %arg7[%c0_16, %c0_17] : memref<2x32xf32, #tpu.memory_space<vmem>>, vector<2x32xf32>
    %42 = arith.truncf %41 : vector<2x32xf32> to vector<2x32xbf16>
    %c0_18 = arith.constant 0 : index
    %c0_19 = arith.constant 0 : index
    %43 = vector.load %arg3[%c0_18, %c0_19] : memref<32x128xbf16, #tpu.memory_space<vmem>>, vector<32x128xbf16>
    %cst_20 = arith.constant dense<0.000000e+00> : vector<2x128xf32>
    %44 = tpu.matmul %42, %43, %cst_20 {dimension_numbers = #tpu.dot_dimension_numbers<[1], [0], [0], [1], [0, 0, 1, 1], [], []>} : vector<2x32xbf16>, vector<32x128xbf16>, vector<2x128xf32> -> vector<2x128xf32>
    %45 = arith.addf %40, %44 : vector<2x128xf32>
    %46 = arith.negf %45 : vector<2x128xf32>
    %47 = math.exp %46 : vector<2x128xf32>
    %cst_21 = arith.constant 1.000000e+00 : f32
    %48 = vector.broadcast %cst_21 : f32 to vector<2x128xf32>
    %49 = arith.addf %48, %47 : vector<2x128xf32>
    %50 = arith.divf %48, %49 : vector<2x128xf32>
    %51 = math.tanh %45 : vector<2x128xf32>
    %52 = arith.select %8, %51, %50 : vector<2x128xi1>, vector<2x128xf32>
    %53 = vector.extract_strided_slice %52 {offsets = [0, 0], sizes = [2, 32], strides = [1, 1]} : vector<2x128xf32> to vector<2x32xf32>
    %54 = vector.extract_strided_slice %52 {offsets = [0, 32], sizes = [2, 32], strides = [1, 1]} : vector<2x128xf32> to vector<2x32xf32>
    %55 = vector.extract_strided_slice %52 {offsets = [0, 64], sizes = [2, 32], strides = [1, 1]} : vector<2x128xf32> to vector<2x32xf32>
    %56 = vector.extract_strided_slice %52 {offsets = [0, 96], sizes = [2, 32], strides = [1, 1]} : vector<2x128xf32> to vector<2x32xf32>
    %c0_22 = arith.constant 0 : index
    %c0_23 = arith.constant 0 : index
    %57 = vector.load %arg8[%c0_22, %c0_23] : memref<2x32xf32, #tpu.memory_space<vmem>>, vector<2x32xf32>
    %58 = arith.mulf %54, %57 : vector<2x32xf32>
    %59 = arith.mulf %53, %55 : vector<2x32xf32>
    %60 = arith.addf %58, %59 : vector<2x32xf32>
    %c0_24 = arith.constant 0 : index
    %c0_25 = arith.constant 0 : index
    %61 = vector.load %arg8[%c0_24, %c0_25] : memref<2x32xf32, #tpu.memory_space<vmem>>, vector<2x32xf32>
    tpu.vector_store %arg8[%c0_24, %c0_25], %60 {strides = array<i32>} : memref<2x32xf32, #tpu.memory_space<vmem>>, vector<2x32xf32>,
    %62 = math.tanh %60 : vector<2x32xf32>
    %63 = arith.mulf %56, %62 : vector<2x32xf32>
    %c0_26 = arith.constant 0 : index
    %c0_27 = arith.constant 0 : index
    %64 = vector.load %arg7[%c0_26, %c0_27] : memref<2x32xf32, #tpu.memory_space<vmem>>, vector<2x32xf32>
    tpu.vector_store %arg7[%c0_26, %c0_27], %63 {strides = array<i32>} : memref<2x32xf32, #tpu.memory_space<vmem>>, vector<2x32xf32>,
    %c2_i32 = arith.constant 2 : i32
    %65 = arith.index_cast %c2_i32 : i32 to index
    %c0_28 = arith.constant 0 : index
    %c0_29 = arith.constant 0 : index
    %66 = vector.load %arg2[%65, %c0_28, %c0_29] : memref<8x2x128xbf16, #tpu.memory_space<vmem>>, vector<1x2x128xbf16>
    %67 = vector.shape_cast %66 : vector<1x2x128xbf16> to vector<2x128xbf16>
    %68 = arith.extf %67 : vector<2x128xbf16> to vector<2x128xf32>
    %c0_30 = arith.constant 0 : index
    %c0_31 = arith.constant 0 : index
    %69 = vector.load %arg7[%c0_30, %c0_31] : memref<2x32xf32, #tpu.memory_space<vmem>>, vector<2x32xf32>
    %70 = arith.truncf %69 : vector<2x32xf32> to vector<2x32xbf16>
    %c0_32 = arith.constant 0 : index
    %c0_33 = arith.constant 0 : index
    %71 = vector.load %arg3[%c0_32, %c0_33] : memref<32x128xbf16, #tpu.memory_space<vmem>>, vector<32x128xbf16>
    %cst_34 = arith.constant dense<0.000000e+00> : vector<2x128xf32>
    %72 = tpu.matmul %70, %71, %cst_34 {dimension_numbers = #tpu.dot_dimension_numbers<[1], [0], [0], [1], [0, 0, 1, 1], [], []>} : vector<2x32xbf16>, vector<32x128xbf16>, vector<2x128xf32> -> vector<2x128xf32>
    %73 = arith.addf %68, %72 : vector<2x128xf32>
    %74 = arith.negf %73 : vector<2x128xf32>
    %75 = math.exp %74 : vector<2x128xf32>
    %cst_35 = arith.constant 1.000000e+00 : f32
    %76 = vector.broadcast %cst_35 : f32 to vector<2x128xf32>
    %77 = arith.addf %76, %75 : vector<2x128xf32>
    %78 = arith.divf %76, %77 : vector<2x128xf32>
    %79 = math.tanh %73 : vector<2x128xf32>
    %80 = arith.select %8, %79, %78 : vector<2x128xi1>, vector<2x128xf32>
    %81 = vector.extract_strided_slice %80 {offsets = [0, 0], sizes = [2, 32], strides = [1, 1]} : vector<2x128xf32> to vector<2x32xf32>
    %82 = vector.extract_strided_slice %80 {offsets = [0, 32], sizes = [2, 32], strides = [1, 1]} : vector<2x128xf32> to vector<2x32xf32>
    %83 = vector.extract_strided_slice %80 {offsets = [0, 64], sizes = [2, 32], strides = [1, 1]} : vector<2x128xf32> to vector<2x32xf32>
    %84 = vector.extract_strided_slice %80 {offsets = [0, 96], sizes = [2, 32], strides = [1, 1]} : vector<2x128xf32> to vector<2x32xf32>
    %c0_36 = arith.constant 0 : index
    %c0_37 = arith.constant 0 : index
    %85 = vector.load %arg8[%c0_36, %c0_37] : memref<2x32xf32, #tpu.memory_space<vmem>>, vector<2x32xf32>
    %86 = arith.mulf %82, %85 : vector<2x32xf32>
    %87 = arith.mulf %81, %83 : vector<2x32xf32>
    %88 = arith.addf %86, %87 : vector<2x32xf32>
    %c0_38 = arith.constant 0 : index
    %c0_39 = arith.constant 0 : index
    %89 = vector.load %arg8[%c0_38, %c0_39] : memref<2x32xf32, #tpu.memory_space<vmem>>, vector<2x32xf32>
    tpu.vector_store %arg8[%c0_38, %c0_39], %88 {strides = array<i32>} : memref<2x32xf32, #tpu.memory_space<vmem>>, vector<2x32xf32>,
    %90 = math.tanh %88 : vector<2x32xf32>
    %91 = arith.mulf %84, %90 : vector<2x32xf32>
    %c0_40 = arith.constant 0 : index
    %c0_41 = arith.constant 0 : index
    %92 = vector.load %arg7[%c0_40, %c0_41] : memref<2x32xf32, #tpu.memory_space<vmem>>, vector<2x32xf32>
    tpu.vector_store %arg7[%c0_40, %c0_41], %91 {strides = array<i32>} : memref<2x32xf32, #tpu.memory_space<vmem>>, vector<2x32xf32>,
    %c3_i32 = arith.constant 3 : i32
    %93 = arith.index_cast %c3_i32 : i32 to index
    %c0_42 = arith.constant 0 : index
    %c0_43 = arith.constant 0 : index
    %94 = vector.load %arg2[%93, %c0_42, %c0_43] : memref<8x2x128xbf16, #tpu.memory_space<vmem>>, vector<1x2x128xbf16>
    %95 = vector.shape_cast %94 : vector<1x2x128xbf16> to vector<2x128xbf16>
    %96 = arith.extf %95 : vector<2x128xbf16> to vector<2x128xf32>
    %c0_44 = arith.constant 0 : index
    %c0_45 = arith.constant 0 : index
    %97 = vector.load %arg7[%c0_44, %c0_45] : memref<2x32xf32, #tpu.memory_space<vmem>>, vector<2x32xf32>
    %98 = arith.truncf %97 : vector<2x32xf32> to vector<2x32xbf16>
    %c0_46 = arith.constant 0 : index
    %c0_47 = arith.constant 0 : index
    %99 = vector.load %arg3[%c0_46, %c0_47] : memref<32x128xbf16, #tpu.memory_space<vmem>>, vector<32x128xbf16>
    %cst_48 = arith.constant dense<0.000000e+00> : vector<2x128xf32>
    %100 = tpu.matmul %98, %99, %cst_48 {dimension_numbers = #tpu.dot_dimension_numbers<[1], [0], [0], [1], [0, 0, 1, 1], [], []>} : vector<2x32xbf16>, vector<32x128xbf16>, vector<2x128xf32> -> vector<2x128xf32>
    %101 = arith.addf %96, %100 : vector<2x128xf32>
    %102 = arith.negf %101 : vector<2x128xf32>
    %103 = math.exp %102 : vector<2x128xf32>
    %cst_49 = arith.constant 1.000000e+00 : f32
    %104 = vector.broadcast %cst_49 : f32 to vector<2x128xf32>
    %105 = arith.addf %104, %103 : vector<2x128xf32>
    %106 = arith.divf %104, %105 : vector<2x128xf32>
    %107 = math.tanh %101 : vector<2x128xf32>
    %108 = arith.select %8, %107, %106 : vector<2x128xi1>, vector<2x128xf32>
    %109 = vector.extract_strided_slice %108 {offsets = [0, 0], sizes = [2, 32], strides = [1, 1]} : vector<2x128xf32> to vector<2x32xf32>
    %110 = vector.extract_strided_slice %108 {offsets = [0, 32], sizes = [2, 32], strides = [1, 1]} : vector<2x128xf32> to vector<2x32xf32>
    %111 = vector.extract_strided_slice %108 {offsets = [0, 64], sizes = [2, 32], strides = [1, 1]} : vector<2x128xf32> to vector<2x32xf32>
    %112 = vector.extract_strided_slice %108 {offsets = [0, 96], sizes = [2, 32], strides = [1, 1]} : vector<2x128xf32> to vector<2x32xf32>
    %c0_50 = arith.constant 0 : index
    %c0_51 = arith.constant 0 : index
    %113 = vector.load %arg8[%c0_50, %c0_51] : memref<2x32xf32, #tpu.memory_space<vmem>>, vector<2x32xf32>
    %114 = arith.mulf %110, %113 : vector<2x32xf32>
    %115 = arith.mulf %109, %111 : vector<2x32xf32>
    %116 = arith.addf %114, %115 : vector<2x32xf32>
    %c0_52 = arith.constant 0 : index
    %c0_53 = arith.constant 0 : index
    %117 = vector.load %arg8[%c0_52, %c0_53] : memref<2x32xf32, #tpu.memory_space<vmem>>, vector<2x32xf32>
    tpu.vector_store %arg8[%c0_52, %c0_53], %116 {strides = array<i32>} : memref<2x32xf32, #tpu.memory_space<vmem>>, vector<2x32xf32>,
    %118 = math.tanh %116 : vector<2x32xf32>
    %119 = arith.mulf %112, %118 : vector<2x32xf32>
    %c0_54 = arith.constant 0 : index
    %c0_55 = arith.constant 0 : index
    %120 = vector.load %arg7[%c0_54, %c0_55] : memref<2x32xf32, #tpu.memory_space<vmem>>, vector<2x32xf32>
    tpu.vector_store %arg7[%c0_54, %c0_55], %119 {strides = array<i32>} : memref<2x32xf32, #tpu.memory_space<vmem>>, vector<2x32xf32>,
    %c4_i32 = arith.constant 4 : i32
    %121 = arith.index_cast %c4_i32 : i32 to index
    %c0_56 = arith.constant 0 : index
    %c0_57 = arith.constant 0 : index
    %122 = vector.load %arg2[%121, %c0_56, %c0_57] : memref<8x2x128xbf16, #tpu.memory_space<vmem>>, vector<1x2x128xbf16>
    %123 = vector.shape_cast %122 : vector<1x2x128xbf16> to vector<2x128xbf16>
    %124 = arith.extf %123 : vector<2x128xbf16> to vector<2x128xf32>
    %c0_58 = arith.constant 0 : index
    %c0_59 = arith.constant 0 : index
    %125 = vector.load %arg7[%c0_58, %c0_59] : memref<2x32xf32, #tpu.memory_space<vmem>>, vector<2x32xf32>
    %126 = arith.truncf %125 : vector<2x32xf32> to vector<2x32xbf16>
    %c0_60 = arith.constant 0 : index
    %c0_61 = arith.constant 0 : index
    %127 = vector.load %arg3[%c0_60, %c0_61] : memref<32x128xbf16, #tpu.memory_space<vmem>>, vector<32x128xbf16>
    %cst_62 = arith.constant dense<0.000000e+00> : vector<2x128xf32>
    %128 = tpu.matmul %126, %127, %cst_62 {dimension_numbers = #tpu.dot_dimension_numbers<[1], [0], [0], [1], [0, 0, 1, 1], [], []>} : vector<2x32xbf16>, vector<32x128xbf16>, vector<2x128xf32> -> vector<2x128xf32>
    %129 = arith.addf %124, %128 : vector<2x128xf32>
    %130 = arith.negf %129 : vector<2x128xf32>
    %131 = math.exp %130 : vector<2x128xf32>
    %cst_63 = arith.constant 1.000000e+00 : f32
    %132 = vector.broadcast %cst_63 : f32 to vector<2x128xf32>
    %133 = arith.addf %132, %131 : vector<2x128xf32>
    %134 = arith.divf %132, %133 : vector<2x128xf32>
    %135 = math.tanh %129 : vector<2x128xf32>
    %136 = arith.select %8, %135, %134 : vector<2x128xi1>, vector<2x128xf32>
    %137 = vector.extract_strided_slice %136 {offsets = [0, 0], sizes = [2, 32], strides = [1, 1]} : vector<2x128xf32> to vector<2x32xf32>
    %138 = vector.extract_strided_slice %136 {offsets = [0, 32], sizes = [2, 32], strides = [1, 1]} : vector<2x128xf32> to vector<2x32xf32>
    %139 = vector.extract_strided_slice %136 {offsets = [0, 64], sizes = [2, 32], strides = [1, 1]} : vector<2x128xf32> to vector<2x32xf32>
    %140 = vector.extract_strided_slice %136 {offsets = [0, 96], sizes = [2, 32], strides = [1, 1]} : vector<2x128xf32> to vector<2x32xf32>
    %c0_64 = arith.constant 0 : index
    %c0_65 = arith.constant 0 : index
    %141 = vector.load %arg8[%c0_64, %c0_65] : memref<2x32xf32, #tpu.memory_space<vmem>>, vector<2x32xf32>
    %142 = arith.mulf %138, %141 : vector<2x32xf32>
    %143 = arith.mulf %137, %139 : vector<2x32xf32>
    %144 = arith.addf %142, %143 : vector<2x32xf32>
    %c0_66 = arith.constant 0 : index
    %c0_67 = arith.constant 0 : index
    %145 = vector.load %arg8[%c0_66, %c0_67] : memref<2x32xf32, #tpu.memory_space<vmem>>, vector<2x32xf32>
    tpu.vector_store %arg8[%c0_66, %c0_67], %144 {strides = array<i32>} : memref<2x32xf32, #tpu.memory_space<vmem>>, vector<2x32xf32>,
    %146 = math.tanh %144 : vector<2x32xf32>
    %147 = arith.mulf %140, %146 : vector<2x32xf32>
    %c0_68 = arith.constant 0 : index
    %c0_69 = arith.constant 0 : index
    %148 = vector.load %arg7[%c0_68, %c0_69] : memref<2x32xf32, #tpu.memory_space<vmem>>, vector<2x32xf32>
    tpu.vector_store %arg7[%c0_68, %c0_69], %147 {strides = array<i32>} : memref<2x32xf32, #tpu.memory_space<vmem>>, vector<2x32xf32>,
    %c5_i32 = arith.constant 5 : i32
    %149 = arith.index_cast %c5_i32 : i32 to index
    %c0_70 = arith.constant 0 : index
    %c0_71 = arith.constant 0 : index
    %150 = vector.load %arg2[%149, %c0_70, %c0_71] : memref<8x2x128xbf16, #tpu.memory_space<vmem>>, vector<1x2x128xbf16>
    %151 = vector.shape_cast %150 : vector<1x2x128xbf16> to vector<2x128xbf16>
    %152 = arith.extf %151 : vector<2x128xbf16> to vector<2x128xf32>
    %c0_72 = arith.constant 0 : index
    %c0_73 = arith.constant 0 : index
    %153 = vector.load %arg7[%c0_72, %c0_73] : memref<2x32xf32, #tpu.memory_space<vmem>>, vector<2x32xf32>
    %154 = arith.truncf %153 : vector<2x32xf32> to vector<2x32xbf16>
    %c0_74 = arith.constant 0 : index
    %c0_75 = arith.constant 0 : index
    %155 = vector.load %arg3[%c0_74, %c0_75] : memref<32x128xbf16, #tpu.memory_space<vmem>>, vector<32x128xbf16>
    %cst_76 = arith.constant dense<0.000000e+00> : vector<2x128xf32>
    %156 = tpu.matmul %154, %155, %cst_76 {dimension_numbers = #tpu.dot_dimension_numbers<[1], [0], [0], [1], [0, 0, 1, 1], [], []>} : vector<2x32xbf16>, vector<32x128xbf16>, vector<2x128xf32> -> vector<2x128xf32>
    %157 = arith.addf %152, %156 : vector<2x128xf32>
    %158 = arith.negf %157 : vector<2x128xf32>
    %159 = math.exp %158 : vector<2x128xf32>
    %cst_77 = arith.constant 1.000000e+00 : f32
    %160 = vector.broadcast %cst_77 : f32 to vector<2x128xf32>
    %161 = arith.addf %160, %159 : vector<2x128xf32>
    %162 = arith.divf %160, %161 : vector<2x128xf32>
    %163 = math.tanh %157 : vector<2x128xf32>
    %164 = arith.select %8, %163, %162 : vector<2x128xi1>, vector<2x128xf32>
    %165 = vector.extract_strided_slice %164 {offsets = [0, 0], sizes = [2, 32], strides = [1, 1]} : vector<2x128xf32> to vector<2x32xf32>
    %166 = vector.extract_strided_slice %164 {offsets = [0, 32], sizes = [2, 32], strides = [1, 1]} : vector<2x128xf32> to vector<2x32xf32>
    %167 = vector.extract_strided_slice %164 {offsets = [0, 64], sizes = [2, 32], strides = [1, 1]} : vector<2x128xf32> to vector<2x32xf32>
    %168 = vector.extract_strided_slice %164 {offsets = [0, 96], sizes = [2, 32], strides = [1, 1]} : vector<2x128xf32> to vector<2x32xf32>
    %c0_78 = arith.constant 0 : index
    %c0_79 = arith.constant 0 : index
    %169 = vector.load %arg8[%c0_78, %c0_79] : memref<2x32xf32, #tpu.memory_space<vmem>>, vector<2x32xf32>
    %170 = arith.mulf %166, %169 : vector<2x32xf32>
    %171 = arith.mulf %165, %167 : vector<2x32xf32>
    %172 = arith.addf %170, %171 : vector<2x32xf32>
    %c0_80 = arith.constant 0 : index
    %c0_81 = arith.constant 0 : index
    %173 = vector.load %arg8[%c0_80, %c0_81] : memref<2x32xf32, #tpu.memory_space<vmem>>, vector<2x32xf32>
    tpu.vector_store %arg8[%c0_80, %c0_81], %172 {strides = array<i32>} : memref<2x32xf32, #tpu.memory_space<vmem>>, vector<2x32xf32>,
    %174 = math.tanh %172 : vector<2x32xf32>
    %175 = arith.mulf %168, %174 : vector<2x32xf32>
    %c0_82 = arith.constant 0 : index
    %c0_83 = arith.constant 0 : index
    %176 = vector.load %arg7[%c0_82, %c0_83] : memref<2x32xf32, #tpu.memory_space<vmem>>, vector<2x32xf32>
    tpu.vector_store %arg7[%c0_82, %c0_83], %175 {strides = array<i32>} : memref<2x32xf32, #tpu.memory_space<vmem>>, vector<2x32xf32>,
    %c6_i32 = arith.constant 6 : i32
    %177 = arith.index_cast %c6_i32 : i32 to index
    %c0_84 = arith.constant 0 : index
    %c0_85 = arith.constant 0 : index
    %178 = vector.load %arg2[%177, %c0_84, %c0_85] : memref<8x2x128xbf16, #tpu.memory_space<vmem>>, vector<1x2x128xbf16>
    %179 = vector.shape_cast %178 : vector<1x2x128xbf16> to vector<2x128xbf16>
    %180 = arith.extf %179 : vector<2x128xbf16> to vector<2x128xf32>
    %c0_86 = arith.constant 0 : index
    %c0_87 = arith.constant 0 : index
    %181 = vector.load %arg7[%c0_86, %c0_87] : memref<2x32xf32, #tpu.memory_space<vmem>>, vector<2x32xf32>
    %182 = arith.truncf %181 : vector<2x32xf32> to vector<2x32xbf16>
    %c0_88 = arith.constant 0 : index
    %c0_89 = arith.constant 0 : index
    %183 = vector.load %arg3[%c0_88, %c0_89] : memref<32x128xbf16, #tpu.memory_space<vmem>>, vector<32x128xbf16>
    %cst_90 = arith.constant dense<0.000000e+00> : vector<2x128xf32>
    %184 = tpu.matmul %182, %183, %cst_90 {dimension_numbers = #tpu.dot_dimension_numbers<[1], [0], [0], [1], [0, 0, 1, 1], [], []>} : vector<2x32xbf16>, vector<32x128xbf16>, vector<2x128xf32> -> vector<2x128xf32>
    %185 = arith.addf %180, %184 : vector<2x128xf32>
    %186 = arith.negf %185 : vector<2x128xf32>
    %187 = math.exp %186 : vector<2x128xf32>
    %cst_91 = arith.constant 1.000000e+00 : f32
    %188 = vector.broadcast %cst_91 : f32 to vector<2x128xf32>
    %189 = arith.addf %188, %187 : vector<2x128xf32>
    %190 = arith.divf %188, %189 : vector<2x128xf32>
    %191 = math.tanh %185 : vector<2x128xf32>
    %192 = arith.select %8, %191, %190 : vector<2x128xi1>, vector<2x128xf32>
    %193 = vector.extract_strided_slice %192 {offsets = [0, 0], sizes = [2, 32], strides = [1, 1]} : vector<2x128xf32> to vector<2x32xf32>
    %194 = vector.extract_strided_slice %192 {offsets = [0, 32], sizes = [2, 32], strides = [1, 1]} : vector<2x128xf32> to vector<2x32xf32>
    %195 = vector.extract_strided_slice %192 {offsets = [0, 64], sizes = [2, 32], strides = [1, 1]} : vector<2x128xf32> to vector<2x32xf32>
    %196 = vector.extract_strided_slice %192 {offsets = [0, 96], sizes = [2, 32], strides = [1, 1]} : vector<2x128xf32> to vector<2x32xf32>
    %c0_92 = arith.constant 0 : index
    %c0_93 = arith.constant 0 : index
    %197 = vector.load %arg8[%c0_92, %c0_93] : memref<2x32xf32, #tpu.memory_space<vmem>>, vector<2x32xf32>
    %198 = arith.mulf %194, %197 : vector<2x32xf32>
    %199 = arith.mulf %193, %195 : vector<2x32xf32>
    %200 = arith.addf %198, %199 : vector<2x32xf32>
    %c0_94 = arith.constant 0 : index
    %c0_95 = arith.constant 0 : index
    %201 = vector.load %arg8[%c0_94, %c0_95] : memref<2x32xf32, #tpu.memory_space<vmem>>, vector<2x32xf32>
    tpu.vector_store %arg8[%c0_94, %c0_95], %200 {strides = array<i32>} : memref<2x32xf32, #tpu.memory_space<vmem>>, vector<2x32xf32>,
    %202 = math.tanh %200 : vector<2x32xf32>
    %203 = arith.mulf %196, %202 : vector<2x32xf32>
    %c0_96 = arith.constant 0 : index
    %c0_97 = arith.constant 0 : index
    %204 = vector.load %arg7[%c0_96, %c0_97] : memref<2x32xf32, #tpu.memory_space<vmem>>, vector<2x32xf32>
    tpu.vector_store %arg7[%c0_96, %c0_97], %203 {strides = array<i32>} : memref<2x32xf32, #tpu.memory_space<vmem>>, vector<2x32xf32>,
    %c7_i32 = arith.constant 7 : i32
    %205 = arith.index_cast %c7_i32 : i32 to index
    %c0_98 = arith.constant 0 : index
    %c0_99 = arith.constant 0 : index
    %206 = vector.load %arg2[%205, %c0_98, %c0_99] : memref<8x2x128xbf16, #tpu.memory_space<vmem>>, vector<1x2x128xbf16>
    %207 = vector.shape_cast %206 : vector<1x2x128xbf16> to vector<2x128xbf16>
    %208 = arith.extf %207 : vector<2x128xbf16> to vector<2x128xf32>
    %c0_100 = arith.constant 0 : index
    %c0_101 = arith.constant 0 : index
    %209 = vector.load %arg7[%c0_100, %c0_101] : memref<2x32xf32, #tpu.memory_space<vmem>>, vector<2x32xf32>
    %210 = arith.truncf %209 : vector<2x32xf32> to vector<2x32xbf16>
    %c0_102 = arith.constant 0 : index
    %c0_103 = arith.constant 0 : index
    %211 = vector.load %arg3[%c0_102, %c0_103] : memref<32x128xbf16, #tpu.memory_space<vmem>>, vector<32x128xbf16>
    %cst_104 = arith.constant dense<0.000000e+00> : vector<2x128xf32>
    %212 = tpu.matmul %210, %211, %cst_104 {dimension_numbers = #tpu.dot_dimension_numbers<[1], [0], [0], [1], [0, 0, 1, 1], [], []>} : vector<2x32xbf16>, vector<32x128xbf16>, vector<2x128xf32> -> vector<2x128xf32>
    %213 = arith.addf %208, %212 : vector<2x128xf32>
    %214 = arith.negf %213 : vector<2x128xf32>
    %215 = math.exp %214 : vector<2x128xf32>
    %cst_105 = arith.constant 1.000000e+00 : f32
    %216 = vector.broadcast %cst_105 : f32 to vector<2x128xf32>
    %217 = arith.addf %216, %215 : vector<2x128xf32>
    %218 = arith.divf %216, %217 : vector<2x128xf32>
    %219 = math.tanh %213 : vector<2x128xf32>
    %220 = arith.select %8, %219, %218 : vector<2x128xi1>, vector<2x128xf32>
    %221 = vector.extract_strided_slice %220 {offsets = [0, 0], sizes = [2, 32], strides = [1, 1]} : vector<2x128xf32> to vector<2x32xf32>
    %222 = vector.extract_strided_slice %220 {offsets = [0, 32], sizes = [2, 32], strides = [1, 1]} : vector<2x128xf32> to vector<2x32xf32>
    %223 = vector.extract_strided_slice %220 {offsets = [0, 64], sizes = [2, 32], strides = [1, 1]} : vector<2x128xf32> to vector<2x32xf32>
    %224 = vector.extract_strided_slice %220 {offsets = [0, 96], sizes = [2, 32], strides = [1, 1]} : vector<2x128xf32> to vector<2x32xf32>
    %c0_106 = arith.constant 0 : index
    %c0_107 = arith.constant 0 : index
    %225 = vector.load %arg8[%c0_106, %c0_107] : memref<2x32xf32, #tpu.memory_space<vmem>>, vector<2x32xf32>
    %226 = arith.mulf %222, %225 : vector<2x32xf32>
    %227 = arith.mulf %221, %223 : vector<2x32xf32>
    %228 = arith.addf %226, %227 : vector<2x32xf32>
    %c0_108 = arith.constant 0 : index
    %c0_109 = arith.constant 0 : index
    %229 = vector.load %arg8[%c0_108, %c0_109] : memref<2x32xf32, #tpu.memory_space<vmem>>, vector<2x32xf32>
    tpu.vector_store %arg8[%c0_108, %c0_109], %228 {strides = array<i32>} : memref<2x32xf32, #tpu.memory_space<vmem>>, vector<2x32xf32>,
    %230 = math.tanh %228 : vector<2x32xf32>
    %231 = arith.mulf %224, %230 : vector<2x32xf32>
    %c0_110 = arith.constant 0 : index
    %c0_111 = arith.constant 0 : index
    %232 = vector.load %arg7[%c0_110, %c0_111] : memref<2x32xf32, #tpu.memory_space<vmem>>, vector<2x32xf32>
    tpu.vector_store %arg7[%c0_110, %c0_111], %231 {strides = array<i32>} : memref<2x32xf32, #tpu.memory_space<vmem>>, vector<2x32xf32>,
    %c8_i32 = arith.constant 8 : i32
    %c0_i32_112 = arith.constant 0 : i32
    %233 = arith.cmpi eq, %arg1, %c0_i32_112 : i32
    %234 = arith.extui %233 : i1 to i32
    %c0_i32_113 = arith.constant 0 : i32
    %235 = arith.cmpi ne, %234, %c0_i32_113 : i32
    scf.if %235 {
      %c0_114 = arith.constant 0 : index
      %c0_115 = arith.constant 0 : index
      %236 = vector.load %arg7[%c0_114, %c0_115] : memref<2x32xf32, #tpu.memory_space<vmem>>, vector<2x32xf32>
      %237 = arith.truncf %236 : vector<2x32xf32> to vector<2x32xbf16>
      %c0_116 = arith.constant 0 : index
      %c0_117 = arith.constant 0 : index
      %238 = vector.load %arg4[%c0_116, %c0_117] : memref<32x8xbf16, #tpu.memory_space<vmem>>, vector<32x8xbf16>
      %cst_118 = arith.constant dense<0.000000e+00> : vector<2x8xf32>
      %239 = tpu.matmul %237, %238, %cst_118 {dimension_numbers = #tpu.dot_dimension_numbers<[1], [0], [0], [1], [0, 0, 1, 1], [], []>} : vector<2x32xbf16>, vector<32x8xbf16>, vector<2x8xf32> -> vector<2x8xf32>
      %c0_119 = arith.constant 0 : index
      %c0_120 = arith.constant 0 : index
      %240 = vector.load %arg5[%c0_119, %c0_120] : memref<1x8xf32, #tpu.memory_space<vmem>>, vector<1x8xf32>
      %241 = vector.broadcast %240 : vector<1x8xf32> to vector<2x8xf32>
      %242 = arith.addf %239, %241 : vector<2x8xf32>
      %c0_121 = arith.constant 0 : index
      %c0_122 = arith.constant 0 : index
      %243 = vector.load %arg6[%c0_121, %c0_122] : memref<2x8xf32, #tpu.memory_space<vmem>>, vector<2x8xf32>
      tpu.vector_store %arg6[%c0_121, %c0_122], %242 {strides = array<i32>} : memref<2x8xf32, #tpu.memory_space<vmem>>, vector<2x8xf32>,
    } else {
    }
    return
  }
  func.func @transform_0(%arg0: i32, %arg1: i32) -> (i32, i32, i32) {
    %c0_i32 = arith.constant 0 : i32
    %c0_i32_0 = arith.constant 0 : i32
    return %arg1, %arg0, %c0_i32 : i32, i32, i32
  }
  func.func @transform_1(%arg0: i32, %arg1: i32) -> (i32, i32) {
    %c0_i32 = arith.constant 0 : i32
    %c0_i32_0 = arith.constant 0 : i32
    %c0_i32_1 = arith.constant 0 : i32
    return %c0_i32, %c0_i32_0 : i32, i32
  }
  func.func @transform_2(%arg0: i32, %arg1: i32) -> (i32, i32) {
    %c0_i32 = arith.constant 0 : i32
    %c0_i32_0 = arith.constant 0 : i32
    %c0_i32_1 = arith.constant 0 : i32
    return %c0_i32, %c0_i32_0 : i32, i32
  }
  func.func @transform_3(%arg0: i32, %arg1: i32) -> (i32, i32) {
    %c0_i32 = arith.constant 0 : i32
    %c0_i32_0 = arith.constant 0 : i32
    %c0_i32_1 = arith.constant 0 : i32
    return %c0_i32, %c0_i32_0 : i32, i32
  }
  func.func @transform_4(%arg0: i32, %arg1: i32) -> (i32, i32) {
    %c0_i32 = arith.constant 0 : i32
    %c0_i32_0 = arith.constant 0 : i32
    return %arg0, %c0_i32 : i32, i32
  }
}

</mosaic_0001>

<bundles_post_ra>
// kernel: lstm_forward.2
= control target key start
LH: loop header
LB: loop body
LE: loop exit
PB: predicated region body
PF: predicated region fallthrough
CT: control target
= control target key end

     0   :  { %v121_v0 = vmov 0.0   ;;  %vm122_vm0 = vmmov 0   ;;  %vm37_vm1 = vcmask 130048   ;;  %s155_s1 = inlined_call_operand.vmem [shape: bf16[16,128], index: 1, kind: input, shape index: {}]   ;;  %s156_s0 = inlined_call_operand.vmem [shape: bf16[16,16], index: 0, kind: input, shape index: {}]   ;;  %s157_s2 = inlined_call_operand.vmem [shape: f32[1,128], index: 2, kind: input, shape index: {}]   ;;  %s158_s3 = inlined_call_operand.vmem [shape: bf16[16,128], index: 3, kind: output, shape index: {}]  }
   0x1   :  { %111 = vmatprep.subr.bf16.mxu0 %v121_v0  ;;  %v119_v1 = vld [vmem:[%s155_s1] sm:$0xff]   ;;  %113 = vmatprep.mubr.msk.bf16.mxu0 %vm122_vm0, %v121_v0 }
   0x2   :  { %v120_v2 = vld [vmem:[%s156_s0] sm:$0xff]   ;;  %112 = vmatpush3.bf16.msra.mxu0 %v119_v1 }
   0x3   :  { %v96_v3 = vld [vmem:[%s157_s2] ss:$0 sm:$0xff] }
   0x5   :  { %114 = vmatmul.mubr.msk.bf16.vlgmr.msra.gmra.mrb[0].mxu0 %vm37_vm1, %v120_v2 }
  0xd8   :  { %v75_v4 = vpop.f32.mrb[0].mxu0 }
  0xd9   :  { %v115_v5 = vpop.f32.mrb[1].mxu0  ;;  %v76_v7 = vadd.f32 %v96_v3, %v75_v4 }
  0xda   :  { %v78_v6 = vpop.f32.mrb[2].mxu0 }
  0xdb   :  { %v79_v8 = vadd.f32 %v96_v3, %v78_v6  ;;  %v116_v9 = vpop.f32.mrb[3].mxu0 }
  0xdd   :  { %v107_v10 = vpack.c.bf16 %v79_v8, %v76_v7 }
  0xdf   :  { %108 = vst [vmem:[%s158_s3] sm:$0xff] %v107_v10  }

// kernel: lstm_forward.3
= control target key start
LH: loop header
LB: loop body
LE: loop exit
PB: predicated region body
PF: predicated region fallthrough
CT: control target
= control target key end

     0   :  { %v1213_v1 = vmov 0.0   ;;  %vm1214_vm0 = vmmov 0   ;;  %vm23_vm1 = vcmask 254976   ;;  %vm51_vm2 = vcmask 261120   ;;  %s1470_s0 = inlined_call_operand.vmem [shape: bf16[8,2,128], index: 0, kind: input, shape index: {}]   ;;  %s1471_s1 = inlined_call_operand.vmem [shape: bf16[32,128], index: 1, kind: input, shape index: {}]   ;;  %s1472_s2 = inlined_call_operand.vmem [shape: bf16[32,8], index: 2, kind: input, shape index: {}]   ;;  %s1473_s3 = inlined_call_operand.vmem [shape: f32[1,8], index: 3, kind: input, shape index: {}]   ;;  %s1474_s4 = inlined_call_operand.hbm [shape: f32[2,8], index: 4, kind: output, shape index: {}]  }
   0x1   :  { %v1107_v0 = vld [vmem:[%s1471_s1] sm:$0xff]   ;;  %1029 = vmatprep.subr.bf16.mxu0 %v1213_v1  ;;  %1037 = vmatprep.subr.bf16.mxu1 %v1213_v1  ;;  %v1108_v2 = vld [vmem:[%s1471_s1 + $0x8] sm:$0xff]   ;;  %24 = vst.msk [vmem:[#allocation2] sm:$0x3] %vm23_vm1, %v1213_v1  ;;  %25 = vst.msk [vmem:[#allocation3] sm:$0x3] %vm23_vm1, %v1213_v1 }
   0x2   :  { %1030 = vmatpush3.bf16.msra.mxu0 %v1107_v0  ;;  %1033 = vmatprep.mubr.msk.bf16.mxu0 %vm1214_vm0, %v1213_v1 }
   0x3   :  { %1031 = vmatprep.subr.bf16.mxu0 %v1213_v1  ;;  %1041 = vmatprep.mubr.msk.bf16.mxu1 %vm1214_vm0, %v1213_v1 }
   0x6   :  { %1032 = vmatpush3.bf16.msra.mxu0 %v1108_v2 }
   0x7   :  { %1045 = vmatprep.subr.bf16.mxu0 %v1213_v1 }
   0x8   :  { %v33_v3 = vld [vmem:[#allocation2] sm:$0x3] }
   0x9   :  { %v34_v4 = vpack.c.bf16 %v33_v3, %v33_v3 }
   0xb   :  { %1034 = vmatmul.mubr.msk.bf16.vlgmr.msra.gmra.mrb[0].mxu0 %vm51_vm2, %v34_v4 }
   0xc   :  { %9 = vsyncpa [#allocation5], 0  ;;  %1049 = vmatprep.mubr.msk.bf16.mxu0 %vm1214_vm0, %v1213_v1  ;;  %v31_v5 = vld [vmem:[%s1470_s0] sm:$0x1]  ;;  %v26_v14 = vlaneseq  ;;  %s1215_s21 = smov 64   ;;  %s1216_s22 = smov 32  }
   0xd   :  { %v32_v6 = vunpack.c.l.bf16 %v31_v5  ;;  %v104_v21 = vld [vmem:[#allocation3] sm:$0x3]  ;;  %s1217_s23 = smov 96   ;;  %v1110_v30 = vld [vmem:[%s1471_s1 + $0x8] sm:$0xff]   ;;  %v963_v38 = vld [vmem:[%s1470_s0 + $0x1] sm:$0x1] }
   0xe   :  { %v27_v16 = vand.u32 127, %v26_v14  ;;  %v1109_v29 = vld [vmem:[%s1471_s1] sm:$0xff]   ;;  %v139_v39 = vunpack.c.l.bf16 %v963_v38  ;;  %v1112_v59 = vld [vmem:[%s1471_s1 + $0x8] sm:$0xff]   ;;  %vm943_vm6 = vcmask 58368  }
   0xf   :  { %1038 = vmatpush3.bf16.msra.mxu1 %v1109_v29  ;;  %v1111_v58 = vld [vmem:[%s1471_s1] sm:$0xff]  }
  0x10   :  { %vm28_vm3 = vcmp.ge.s32.totalorder %v27_v16, 64  ;;  %vm29_vm4 = vcmp.lt.s32.totalorder %v27_v16, 96  ;;  %1039 = vmatprep.subr.bf16.mxu1 %v1213_v1  ;;  %1046 = vmatpush3.bf16.msra.mxu0 %v1111_v58  ;;  %v968_v4 = vld [vmem:[%s1470_s0 + $0x2] sm:$0x1] }
  0x11   :  { %vm1268_vm5 = vmand %vm28_vm3, %vm29_vm4  ;;  %1047 = vmatprep.subr.bf16.mxu0 %v1213_v1  ;;  %v244_v5 = vunpack.c.l.bf16 %v968_v4  ;;  %v1123_v17 = vld [vmem:[%s1472_s2] sm:$0xff]  }
  0x13   :  { %1040 = vmatpush3.bf16.msra.mxu1 %v1110_v30 }
  0x14   :  { %1053 = vmatprep.subr.bf16.mxu1 %v1213_v1  ;;  %1048 = vmatpush3.bf16.msra.mxu0 %v1112_v59 }
  0x15   :  { %1061 = vmatprep.subr.bf16.mxu0 %v1213_v1 }
  0xde   :  { %v89_v7 = vpop.f32.mrb[0].mxu0 }
  0xdf   :  { %v95_v8 = vadd.f32 %v89_v7, %v32_v6  ;;  %v1035_v9 = vpop.f32.mrb[1].mxu0 }
  0xe0   :  { %v92_v10 = vpop.f32.mrb[2].mxu0 }
  0xe1   :  { %v962_v11 = vmul.f32 -1.442695, %v95_v8  ;;  %v1036_v12 = vpop.f32.mrb[3].mxu0 }
  0xe3   :  { %1125 = vpow2.f32 %v962_v11 }
  0xe4   :  { %1127 = vtanh.f32 %v95_v8 }
  0xed   :  { %v1126_v13 = vpop.eup %1125 }
  0xee   :  { %v99_v15 = vadd.f32 1.0, %v1126_v13  ;;  %v1128_v18 = vpop.eup %1127 }
  0xf0   :  { %1129 = vrcp.f32 %v99_v15 }
  0xfa   :  { %v1130_v19 = vpop.eup %1129 }
  0xfb   :  { %v103_v20 = vsel %vm1268_vm5, %v1128_v18, %v1130_v19 }
  0xfc   :  { %111 = vrot.lane.b32.xlu0 %v103_v20, %s1215_s21 }
 0x100   :  { %106 = vrot.lane.b32.xlu0 %v104_v21, %s1216_s22 }
 0x16e   :  { %v112_v22 = vpop.permute.xlu0 %111 }
 0x16f   :  { %v114_v23 = vmul.f32 %v112_v22, %v103_v20 }
 0x171   :  { %116 = vrot.lane.b32.xlu1 %v114_v23, %s1216_s22 }
 0x172   :  { %v107_v24 = vpop.permute.xlu0 %106 }
 0x173   :  { %v109_v25 = vmul.f32 %v107_v24, %v103_v20 }
 0x1e3   :  { %v117_v26 = vpop.permute.xlu1 %116 }
 0x1e4   :  { %v119_v27 = vadd.f32 %v117_v26, %v109_v25  ;;  %v1113_v25 = vld [vmem:[%s1471_s1] sm:$0xff]   ;;  %v1114_v26 = vld [vmem:[%s1471_s1 + $0x8] sm:$0xff]  }
 0x1e6   :  { %1131 = vtanh.f32 %v119_v27 }
 0x1f0   :  { %v1132_v28 = vpop.eup %1131 }
 0x1f1   :  { %128 = vrot.lane.b32.xlu1 %v1132_v28, %s1215_s21 }
 0x1f5   :  { %121 = vrot.lane.b32.xlu1 %v119_v27, %s1217_s23 }
 0x263   :  { %v129_v31 = vpop.permute.xlu1 %128 }
 0x264   :  { %v131_v32 = vmul.f32 %v129_v31, %v103_v20 }
 0x266   :  { %133 = vrot.lane.b32.xlu0 %v131_v32, %s1216_s22 }
 0x267   :  { %v122_v33 = vpop.permute.xlu1 %121 }
 0x268   :  { %125 = vst.msk [vmem:[#allocation3] sm:$0x3] %vm23_vm1, %v122_v33 }
 0x26f   :  { %v210_v34 = vld [vmem:[#allocation3] sm:$0x3] }
 0x270   :  { %212 = vrot.lane.b32.xlu1 %v210_v34, %s1216_s22  ;;  %v973_v34 = vld [vmem:[%s1470_s0 + $0x3] sm:$0x1] }
 0x2d8   :  { %v134_v35 = vpop.permute.xlu0 %133 }
 0x2d9   :  { %136 = vst.msk [vmem:[#allocation2] sm:$0x3] %vm23_vm1, %v134_v35  ;;  %v349_v35 = vunpack.c.l.bf16 %v973_v34 }
 0x2e0   :  { %v140_v36 = vld [vmem:[#allocation2] sm:$0x3] }
 0x2e1   :  { %v141_v37 = vpack.c.bf16 %v140_v36, %v140_v36 }
 0x2e2   :  { %v213_v53 = vpop.permute.xlu1 %212 }
 0x2e3   :  { %1042 = vmatmul.mubr.msk.bf16.vlgmr.msra.gmra.mrb[0].mxu1 %vm51_vm2, %v141_v37 }
 0x2e4   :  { %1057 = vmatprep.mubr.msk.bf16.mxu1 %vm1214_vm0, %v1213_v1  ;;  %1054 = vmatpush3.bf16.msra.mxu1 %v1113_v25 }
 0x2e5   :  { %1055 = vmatprep.subr.bf16.mxu1 %v1213_v1 }
 0x2e8   :  { %1056 = vmatpush3.bf16.msra.mxu1 %v1114_v26 }
 0x2e9   :  { %1069 = vmatprep.subr.bf16.mxu1 %v1213_v1 }
 0x3b6   :  { %v195_v40 = vpop.f32.mrb[0].mxu1 }
 0x3b7   :  { %v201_v41 = vadd.f32 %v195_v40, %v139_v39  ;;  %v1043_v42 = vpop.f32.mrb[1].mxu1 }
 0x3b8   :  { %v198_v43 = vpop.f32.mrb[2].mxu1 }
 0x3b9   :  { %v967_v44 = vmul.f32 -1.442695, %v201_v41  ;;  %v1044_v45 = vpop.f32.mrb[3].mxu1 }
 0x3bb   :  { %1133 = vpow2.f32 %v967_v44 }
 0x3bc   :  { %1135 = vtanh.f32 %v201_v41 }
 0x3c5   :  { %v1134_v46 = vpop.eup %1133 }
 0x3c6   :  { %v205_v47 = vadd.f32 1.0, %v1134_v46  ;;  %v1136_v48 = vpop.eup %1135 }
 0x3c8   :  { %1137 = vrcp.f32 %v205_v47 }
 0x3d2   :  { %v1138_v49 = vpop.eup %1137 }
 0x3d3   :  { %v209_v50 = vsel %vm1268_vm5, %v1136_v48, %v1138_v49 }
 0x3d4   :  { %217 = vrot.lane.b32.xlu0 %v209_v50, %s1215_s21  ;;  %v215_v54 = vmul.f32 %v213_v53, %v209_v50 }
 0x446   :  { %v218_v51 = vpop.permute.xlu0 %217 }
 0x447   :  { %v220_v52 = vmul.f32 %v218_v51, %v209_v50 }
 0x449   :  { %222 = vrot.lane.b32.xlu0 %v220_v52, %s1216_s22 }
 0x4bb   :  { %v223_v55 = vpop.permute.xlu0 %222 }
 0x4bc   :  { %v225_v56 = vadd.f32 %v223_v55, %v215_v54  ;;  %v1115_v54 = vld [vmem:[%s1471_s1] sm:$0xff]   ;;  %v1116_v55 = vld [vmem:[%s1471_s1 + $0x8] sm:$0xff]  }
 0x4be   :  { %1139 = vtanh.f32 %v225_v56 }
 0x4c8   :  { %v1140_v57 = vpop.eup %1139 }
 0x4c9   :  { %233 = vrot.lane.b32.xlu1 %v1140_v57, %s1215_s21 }
 0x4cd   :  { %227 = vrot.lane.b32.xlu1 %v225_v56, %s1217_s23 }
 0x53b   :  { %v234_v60 = vpop.permute.xlu1 %233 }
 0x53c   :  { %v236_v61 = vmul.f32 %v234_v60, %v209_v50 }
 0x53e   :  { %238 = vrot.lane.b32.xlu0 %v236_v61, %s1216_s22 }
 0x53f   :  { %v228_v62 = vpop.permute.xlu1 %227 }
 0x540   :  { %230 = vst.msk [vmem:[#allocation3] sm:$0x3] %vm23_vm1, %v228_v62 }
 0x547   :  { %v315_v63 = vld [vmem:[#allocation3] sm:$0x3] }
 0x548   :  { %317 = vrot.lane.b32.xlu1 %v315_v63, %s1216_s22  ;;  %v978_v63 = vld [vmem:[%s1470_s0 + $0x4] sm:$0x1] }
 0x5b0   :  { %v239_v0 = vpop.permute.xlu0 %238 }
 0x5b1   :  { %241 = vst.msk [vmem:[#allocation2] sm:$0x3] %vm23_vm1, %v239_v0  ;;  %v454_v0 = vunpack.c.l.bf16 %v978_v63 }
 0x5b8   :  { %v245_v2 = vld [vmem:[#allocation2] sm:$0x3] }
 0x5b9   :  { %v246_v3 = vpack.c.bf16 %v245_v2, %v245_v2 }
 0x5ba   :  { %v318_v20 = vpop.permute.xlu1 %317 }
 0x5bb   :  { %1050 = vmatmul.mubr.msk.bf16.vlgmr.msra.gmra.mrb[4].mxu0 %vm51_vm2, %v246_v3 }
 0x5bc   :  { %1065 = vmatprep.mubr.msk.bf16.mxu0 %vm1214_vm0, %v1213_v1  ;;  %1062 = vmatpush3.bf16.msra.mxu0 %v1115_v54 }
 0x5bd   :  { %1063 = vmatprep.subr.bf16.mxu0 %v1213_v1 }
 0x5c0   :  { %1064 = vmatpush3.bf16.msra.mxu0 %v1116_v55 }
 0x5c1   :  { %1077 = vmatprep.subr.bf16.mxu0 %v1213_v1 }
 0x68e   :  { %v300_v6 = vpop.f32.mrb[4].mxu0 }
 0x68f   :  { %v306_v7 = vadd.f32 %v300_v6, %v244_v5  ;;  %v1051_v8 = vpop.f32.mrb[5].mxu0 }
 0x690   :  { %v303_v9 = vpop.f32.mrb[6].mxu0 }
 0x691   :  { %v972_v10 = vmul.f32 -1.442695, %v306_v7  ;;  %v1052_v11 = vpop.f32.mrb[7].mxu0 }
 0x693   :  { %1141 = vpow2.f32 %v972_v10 }
 0x694   :  { %1143 = vtanh.f32 %v306_v7 }
 0x69d   :  { %v1142_v12 = vpop.eup %1141 }
 0x69e   :  { %v310_v13 = vadd.f32 1.0, %v1142_v12  ;;  %v1144_v14 = vpop.eup %1143 }
 0x6a0   :  { %1145 = vrcp.f32 %v310_v13 }
 0x6aa   :  { %v1146_v15 = vpop.eup %1145 }
 0x6ab   :  { %v314_v16 = vsel %vm1268_vm5, %v1144_v14, %v1146_v15 }
 0x6ac   :  { %322 = vrot.lane.b32.xlu0 %v314_v16, %s1215_s21  ;;  %v320_v21 = vmul.f32 %v318_v20, %v314_v16 }
 0x71e   :  { %v323_v18 = vpop.permute.xlu0 %322 }
 0x71f   :  { %v325_v19 = vmul.f32 %v323_v18, %v314_v16 }
 0x721   :  { %327 = vrot.lane.b32.xlu0 %v325_v19, %s1216_s22 }
 0x793   :  { %v328_v22 = vpop.permute.xlu0 %327 }
 0x794   :  { %v330_v23 = vadd.f32 %v328_v22, %v320_v21  ;;  %v1117_v21 = vld [vmem:[%s1471_s1] sm:$0xff]   ;;  %v1118_v22 = vld [vmem:[%s1471_s1 + $0x8] sm:$0xff]  }
 0x796   :  { %1147 = vtanh.f32 %v330_v23 }
 0x7a0   :  { %v1148_v24 = vpop.eup %1147 }
 0x7a1   :  { %338 = vrot.lane.b32.xlu1 %v1148_v24, %s1215_s21 }
 0x7a5   :  { %332 = vrot.lane.b32.xlu1 %v330_v23, %s1217_s23 }
 0x813   :  { %v339_v27 = vpop.permute.xlu1 %338 }
 0x814   :  { %v341_v28 = vmul.f32 %v339_v27, %v314_v16 }
 0x816   :  { %343 = vrot.lane.b32.xlu0 %v341_v28, %s1216_s22 }
 0x817   :  { %v333_v29 = vpop.permute.xlu1 %332 }
 0x818   :  { %335 = vst.msk [vmem:[#allocation3] sm:$0x3] %vm23_vm1, %v333_v29 }
 0x81f   :  { %v420_v30 = vld [vmem:[#allocation3] sm:$0x3] }
 0x820   :  { %422 = vrot.lane.b32.xlu1 %v420_v30, %s1216_s22  ;;  %v983_v30 = vld [vmem:[%s1470_s0 + $0x5] sm:$0x1] }
 0x888   :  { %v344_v31 = vpop.permute.xlu0 %343 }
 0x889   :  { %346 = vst.msk [vmem:[#allocation2] sm:$0x3] %vm23_vm1, %v344_v31  ;;  %v559_v31 = vunpack.c.l.bf16 %v983_v30 }
 0x890   :  { %v350_v32 = vld [vmem:[#allocation2] sm:$0x3] }
 0x891   :  { %v351_v33 = vpack.c.bf16 %v350_v32, %v350_v32 }
 0x892   :  { %v423_v49 = vpop.permute.xlu1 %422 }
 0x893   :  { %1058 = vmatmul.mubr.msk.bf16.vlgmr.msra.gmra.mrb[4].mxu1 %vm51_vm2, %v351_v33 }
 0x894   :  { %1073 = vmatprep.mubr.msk.bf16.mxu1 %vm1214_vm0, %v1213_v1  ;;  %1070 = vmatpush3.bf16.msra.mxu1 %v1117_v21 }
 0x895   :  { %1071 = vmatprep.subr.bf16.mxu1 %v1213_v1 }
 0x898   :  { %1072 = vmatpush3.bf16.msra.mxu1 %v1118_v22 }
 0x899   :  { %1085 = vmatprep.subr.bf16.mxu1 %v1213_v1 }
 0x966   :  { %v405_v36 = vpop.f32.mrb[4].mxu1 }
 0x967   :  { %v411_v37 = vadd.f32 %v405_v36, %v349_v35  ;;  %v1059_v38 = vpop.f32.mrb[5].mxu1 }
 0x968   :  { %v408_v39 = vpop.f32.mrb[6].mxu1 }
 0x969   :  { %v977_v40 = vmul.f32 -1.442695, %v411_v37  ;;  %v1060_v41 = vpop.f32.mrb[7].mxu1 }
 0x96b   :  { %1149 = vpow2.f32 %v977_v40 }
 0x96c   :  { %1151 = vtanh.f32 %v411_v37 }
 0x975   :  { %v1150_v42 = vpop.eup %1149 }
 0x976   :  { %v415_v43 = vadd.f32 1.0, %v1150_v42  ;;  %v1152_v44 = vpop.eup %1151 }
 0x978   :  { %1153 = vrcp.f32 %v415_v43 }
 0x982   :  { %v1154_v45 = vpop.eup %1153 }
 0x983   :  { %v419_v46 = vsel %vm1268_vm5, %v1152_v44, %v1154_v45 }
 0x984   :  { %427 = vrot.lane.b32.xlu0 %v419_v46, %s1215_s21  ;;  %v425_v50 = vmul.f32 %v423_v49, %v419_v46 }
 0x9f6   :  { %v428_v47 = vpop.permute.xlu0 %427 }
 0x9f7   :  { %v430_v48 = vmul.f32 %v428_v47, %v419_v46 }
 0x9f9   :  { %432 = vrot.lane.b32.xlu0 %v430_v48, %s1216_s22 }
 0xa6b   :  { %v433_v51 = vpop.permute.xlu0 %432 }
 0xa6c   :  { %v435_v52 = vadd.f32 %v433_v51, %v425_v50  ;;  %v1119_v50 = vld [vmem:[%s1471_s1] sm:$0xff]   ;;  %v1120_v51 = vld [vmem:[%s1471_s1 + $0x8] sm:$0xff]  }
 0xa6e   :  { %1155 = vtanh.f32 %v435_v52 }
 0xa78   :  { %v1156_v53 = vpop.eup %1155 }
 0xa79   :  { %443 = vrot.lane.b32.xlu1 %v1156_v53, %s1215_s21 }
 0xa7d   :  { %437 = vrot.lane.b32.xlu1 %v435_v52, %s1217_s23 }
 0xaeb   :  { %v444_v56 = vpop.permute.xlu1 %443 }
 0xaec   :  { %v446_v57 = vmul.f32 %v444_v56, %v419_v46 }
 0xaee   :  { %448 = vrot.lane.b32.xlu0 %v446_v57, %s1216_s22 }
 0xaef   :  { %v438_v58 = vpop.permute.xlu1 %437 }
 0xaf0   :  { %440 = vst.msk [vmem:[#allocation3] sm:$0x3] %vm23_vm1, %v438_v58 }
 0xaf7   :  { %v525_v59 = vld [vmem:[#allocation3] sm:$0x3] }
 0xaf8   :  { %527 = vrot.lane.b32.xlu1 %v525_v59, %s1216_s22  ;;  %v988_v59 = vld [vmem:[%s1470_s0 + $0x6] sm:$0x1] }
 0xb60   :  { %v449_v60 = vpop.permute.xlu0 %448 }
 0xb61   :  { %451 = vst.msk [vmem:[#allocation2] sm:$0x3] %vm23_vm1, %v449_v60  ;;  %v664_v60 = vunpack.c.l.bf16 %v988_v59 }
 0xb68   :  { %v455_v61 = vld [vmem:[#allocation2] sm:$0x3] }
 0xb69   :  { %v456_v62 = vpack.c.bf16 %v455_v61, %v455_v61 }
 0xb6a   :  { %v528_v15 = vpop.permute.xlu1 %527 }
 0xb6b   :  { %1066 = vmatmul.mubr.msk.bf16.vlgmr.msra.gmra.mrb[8].mxu0 %vm51_vm2, %v456_v62 }
 0xb6c   :  { %1081 = vmatprep.mubr.msk.bf16.mxu0 %vm1214_vm0, %v1213_v1  ;;  %1078 = vmatpush3.bf16.msra.mxu0 %v1119_v50 }
 0xb6d   :  { %1079 = vmatprep.subr.bf16.mxu0 %v1213_v1 }
 0xb70   :  { %1080 = vmatpush3.bf16.msra.mxu0 %v1120_v51 }
 0xb71   :  { %1093 = vmatprep.subr.bf16.mxu0 %v1213_v1 }
 0xc3e   :  { %v510_v2 = vpop.f32.mrb[8].mxu0 }
 0xc3f   :  { %v516_v3 = vadd.f32 %v510_v2, %v454_v0  ;;  %v1067_v4 = vpop.f32.mrb[9].mxu0 }
 0xc40   :  { %v513_v5 = vpop.f32.mrb[10].mxu0 }
 0xc41   :  { %v982_v6 = vmul.f32 -1.442695, %v516_v3  ;;  %v1068_v7 = vpop.f32.mrb[11].mxu0 }
 0xc43   :  { %1157 = vpow2.f32 %v982_v6 }
 0xc44   :  { %1159 = vtanh.f32 %v516_v3 }
 0xc4d   :  { %v1158_v8 = vpop.eup %1157 }
 0xc4e   :  { %v520_v9 = vadd.f32 1.0, %v1158_v8  ;;  %v1160_v10 = vpop.eup %1159 }
 0xc50   :  { %1161 = vrcp.f32 %v520_v9 }
 0xc5a   :  { %v1162_v11 = vpop.eup %1161 }
 0xc5b   :  { %v524_v12 = vsel %vm1268_vm5, %v1160_v10, %v1162_v11 }
 0xc5c   :  { %532 = vrot.lane.b32.xlu0 %v524_v12, %s1215_s21  ;;  %v530_v16 = vmul.f32 %v528_v15, %v524_v12 }
 0xcce   :  { %v533_v13 = vpop.permute.xlu0 %532 }
 0xccf   :  { %v535_v14 = vmul.f32 %v533_v13, %v524_v12 }
 0xcd1   :  { %537 = vrot.lane.b32.xlu0 %v535_v14, %s1216_s22 }
 0xd43   :  { %v538_v18 = vpop.permute.xlu0 %537 }
 0xd44   :  { %v540_v19 = vadd.f32 %v538_v18, %v530_v16  ;;  %v1121_v16 = vld [vmem:[%s1471_s1] sm:$0xff]   ;;  %v1122_v18 = vld [vmem:[%s1471_s1 + $0x8] sm:$0xff]  }
 0xd46   :  { %1163 = vtanh.f32 %v540_v19 }
 0xd50   :  { %v1164_v20 = vpop.eup %1163 }
 0xd51   :  { %548 = vrot.lane.b32.xlu1 %v1164_v20, %s1215_s21 }
 0xd55   :  { %542 = vrot.lane.b32.xlu1 %v540_v19, %s1217_s23 }
 0xdc3   :  { %v549_v23 = vpop.permute.xlu1 %548 }
 0xdc4   :  { %v551_v24 = vmul.f32 %v549_v23, %v524_v12 }
 0xdc6   :  { %553 = vrot.lane.b32.xlu0 %v551_v24, %s1216_s22 }
 0xdc7   :  { %v543_v25 = vpop.permute.xlu1 %542 }
 0xdc8   :  { %545 = vst.msk [vmem:[#allocation3] sm:$0x3] %vm23_vm1, %v543_v25 }
 0xdcf   :  { %v630_v26 = vld [vmem:[#allocation3] sm:$0x3] }
 0xdd0   :  { %632 = vrot.lane.b32.xlu1 %v630_v26, %s1216_s22  ;;  %v993_v26 = vld [vmem:[%s1470_s0 + $0x7] sm:$0x1] }
 0xe38   :  { %v554_v27 = vpop.permute.xlu0 %553 }
 0xe39   :  { %556 = vst.msk [vmem:[#allocation2] sm:$0x3] %vm23_vm1, %v554_v27  ;;  %v769_v27 = vunpack.c.l.bf16 %v993_v26 }
 0xe40   :  { %v560_v28 = vld [vmem:[#allocation2] sm:$0x3] }
 0xe41   :  { %v561_v29 = vpack.c.bf16 %v560_v28, %v560_v28 }
 0xe42   :  { %v633_v45 = vpop.permute.xlu1 %632 }
 0xe43   :  { %1074 = vmatmul.mubr.msk.bf16.vlgmr.msra.gmra.mrb[8].mxu1 %vm51_vm2, %v561_v29 }
 0xe44   :  { %1089 = vmatprep.mubr.msk.bf16.mxu1 %vm1214_vm0, %v1213_v1  ;;  %1086 = vmatpush3.bf16.msra.mxu1 %v1121_v16 }
 0xe45   :  { %1087 = vmatprep.subr.bf16.mxu1 %v1213_v1 }
 0xe48   :  { %1088 = vmatpush3.bf16.msra.mxu1 %v1122_v18 }
 0xf16   :  { %v615_v32 = vpop.f32.mrb[8].mxu1 }
 0xf17   :  { %v621_v33 = vadd.f32 %v615_v32, %v559_v31  ;;  %v1075_v34 = vpop.f32.mrb[9].mxu1 }
 0xf18   :  { %v618_v35 = vpop.f32.mrb[10].mxu1 }
 0xf19   :  { %v987_v36 = vmul.f32 -1.442695, %v621_v33  ;;  %v1076_v37 = vpop.f32.mrb[11].mxu1 }
 0xf1b   :  { %1165 = vpow2.f32 %v987_v36 }
 0xf1c   :  { %1167 = vtanh.f32 %v621_v33 }
 0xf25   :  { %v1166_v38 = vpop.eup %1165 }
 0xf26   :  { %v625_v39 = vadd.f32 1.0, %v1166_v38  ;;  %v1168_v40 = vpop.eup %1167 }
 0xf28   :  { %1169 = vrcp.f32 %v625_v39 }
 0xf32   :  { %v1170_v41 = vpop.eup %1169 }
 0xf33   :  { %v629_v42 = vsel %vm1268_vm5, %v1168_v40, %v1170_v41 }
 0xf34   :  { %637 = vrot.lane.b32.xlu0 %v629_v42, %s1215_s21  ;;  %v635_v46 = vmul.f32 %v633_v45, %v629_v42 }
 0xfa6   :  { %v638_v43 = vpop.permute.xlu0 %637 }
 0xfa7   :  { %v640_v44 = vmul.f32 %v638_v43, %v629_v42 }
 0xfa9   :  { %642 = vrot.lane.b32.xlu0 %v640_v44, %s1216_s22 }
0x101b   :  { %v643_v47 = vpop.permute.xlu0 %642 }
0x101c   :  { %v645_v48 = vadd.f32 %v643_v47, %v635_v46  ;;  %v1124_v46 = vld [vmem:[%s1472_s2 + $0x8] sm:$0xff]   ;;  %s1218_s2 = smov [#allocation4]  }
0x101d   :  { %s951_s19 = sshll.u32 %s1218_s2, 4  ;;  %s952_s19 = int_to_ptr.vmem [resolvable:$true] %s951_s19 }
0x101e   :  { %1171 = vtanh.f32 %v645_v48  ;;  %p1194_p1 = scmp.lt.s32.totalorder %s952_s19, %s952_s19 }
0x1028   :  { %v1172_v49 = vpop.eup %1171 }
0x1029   :  { %653 = vrot.lane.b32.xlu1 %v1172_v49, %s1215_s21 }
0x102d   :  { %647 = vrot.lane.b32.xlu1 %v645_v48, %s1217_s23 }
0x109b   :  { %v654_v52 = vpop.permute.xlu1 %653 }
0x109c   :  { %v656_v53 = vmul.f32 %v654_v52, %v629_v42 }
0x109e   :  { %658 = vrot.lane.b32.xlu0 %v656_v53, %s1216_s22  ;;  %v998_v53 = vld [vmem:[%s1473_s3] ss:$0 sm:$0xff] }
0x109f   :  { %v648_v54 = vpop.permute.xlu1 %647 }
0x10a0   :  { %650 = vst.msk [vmem:[#allocation3] sm:$0x3] %vm23_vm1, %v648_v54 }
0x10a7   :  { %v735_v55 = vld [vmem:[#allocation3] sm:$0x3] }
0x10a8   :  { %737 = vrot.lane.b32.xlu1 %v735_v55, %s1216_s22 }
0x1110   :  { %v659_v56 = vpop.permute.xlu0 %658 }
0x1111   :  { %661 = vst.msk [vmem:[#allocation2] sm:$0x3] %vm23_vm1, %v659_v56 }
0x1118   :  { %v665_v57 = vld [vmem:[#allocation2] sm:$0x3] }
0x1119   :  { %v666_v58 = vpack.c.bf16 %v665_v57, %v665_v57 }
0x111a   :  { %v738_v11 = vpop.permute.xlu1 %737 }
0x111b   :  { %1082 = vmatmul.mubr.msk.bf16.vlgmr.msra.gmra.mrb[12].mxu0 %vm51_vm2, %v666_v58 }
0x111c   :  { %1097 = vmatprep.mubr.msk.bf16.mxu0 %vm1214_vm0, %v1213_v1  ;;  %1094 = vmatpush3.bf16.msra.mxu0 %v1123_v17 }
0x111d   :  { %1095 = vmatprep.subr.bf16.mxu0 %v1213_v1 }
0x1120   :  { %1096 = vmatpush3.bf16.msra.mxu0 %v1124_v46 }
0x11ee   :  { %v720_v61 = vpop.f32.mrb[12].mxu0 }
0x11ef   :  { %v726_v62 = vadd.f32 %v720_v61, %v664_v60  ;;  %v1083_v63 = vpop.f32.mrb[13].mxu0 }
0x11f0   :  { %v723_v0 = vpop.f32.mrb[14].mxu0 }
0x11f1   :  { %v992_v2 = vmul.f32 -1.442695, %v726_v62  ;;  %v1084_v3 = vpop.f32.mrb[15].mxu0 }
0x11f3   :  { %1173 = vpow2.f32 %v992_v2 }
0x11f4   :  { %1175 = vtanh.f32 %v726_v62 }
0x11fd   :  { %v1174_v4 = vpop.eup %1173 }
0x11fe   :  { %v730_v5 = vadd.f32 1.0, %v1174_v4  ;;  %v1176_v6 = vpop.eup %1175 }
0x1200   :  { %1177 = vrcp.f32 %v730_v5 }
0x120a   :  { %v1178_v7 = vpop.eup %1177 }
0x120b   :  { %v734_v8 = vsel %vm1268_vm5, %v1176_v6, %v1178_v7 }
0x120c   :  { %742 = vrot.lane.b32.xlu0 %v734_v8, %s1215_s21  ;;  %v740_v12 = vmul.f32 %v738_v11, %v734_v8 }
0x127e   :  { %v743_v9 = vpop.permute.xlu0 %742 }
0x127f   :  { %v745_v10 = vmul.f32 %v743_v9, %v734_v8 }
0x1281   :  { %747 = vrot.lane.b32.xlu0 %v745_v10, %s1216_s22 }
0x12f3   :  { %v748_v13 = vpop.permute.xlu0 %747 }
0x12f4   :  { %v750_v14 = vadd.f32 %v748_v13, %v740_v12 }
0x12f6   :  { %1179 = vtanh.f32 %v750_v14 }
0x1300   :  { %v1180_v15 = vpop.eup %1179 }
0x1301   :  { %758 = vrot.lane.b32.xlu1 %v1180_v15, %s1215_s21 }
0x1305   :  { %752 = vrot.lane.b32.xlu1 %v750_v14, %s1217_s23 }
0x1373   :  { %v759_v19 = vpop.permute.xlu1 %758 }
0x1374   :  { %v761_v20 = vmul.f32 %v759_v19, %v734_v8 }
0x1376   :  { %763 = vrot.lane.b32.xlu0 %v761_v20, %s1216_s22 }
0x1377   :  { %v753_v21 = vpop.permute.xlu1 %752 }
0x1378   :  { %755 = vst.msk [vmem:[#allocation3] sm:$0x3] %vm23_vm1, %v753_v21 }
0x137f   :  { %v840_v22 = vld [vmem:[#allocation3] sm:$0x3] }
0x1380   :  { %842 = vrot.lane.b32.xlu1 %v840_v22, %s1216_s22 }
0x13e8   :  { %v764_v23 = vpop.permute.xlu0 %763 }
0x13e9   :  { %766 = vst.msk [vmem:[#allocation2] sm:$0x3] %vm23_vm1, %v764_v23 }
0x13f0   :  { %v770_v24 = vld [vmem:[#allocation2] sm:$0x3] }
0x13f1   :  { %v771_v25 = vpack.c.bf16 %v770_v24, %v770_v24 }
0x13f2   :  { %v843_v41 = vpop.permute.xlu1 %842 }
0x13f3   :  { %1090 = vmatmul.mubr.msk.bf16.vlgmr.msra.gmra.mrb[12].mxu1 %vm51_vm2, %v771_v25 }
0x14c6   :  { %v825_v28 = vpop.f32.mrb[12].mxu1 }
0x14c7   :  { %v831_v29 = vadd.f32 %v825_v28, %v769_v27  ;;  %v1091_v30 = vpop.f32.mrb[13].mxu1 }
0x14c8   :  { %v828_v31 = vpop.f32.mrb[14].mxu1 }
0x14c9   :  { %v997_v32 = vmul.f32 -1.442695, %v831_v29  ;;  %v1092_v33 = vpop.f32.mrb[15].mxu1 }
0x14cb   :  { %1181 = vpow2.f32 %v997_v32 }
0x14cc   :  { %1183 = vtanh.f32 %v831_v29 }
0x14d5   :  { %v1182_v34 = vpop.eup %1181 }
0x14d6   :  { %v835_v35 = vadd.f32 1.0, %v1182_v34  ;;  %v1184_v36 = vpop.eup %1183 }
0x14d8   :  { %1185 = vrcp.f32 %v835_v35 }
0x14e2   :  { %v1186_v37 = vpop.eup %1185 }
0x14e3   :  { %v839_v38 = vsel %vm1268_vm5, %v1184_v36, %v1186_v37 }
0x14e4   :  { %847 = vrot.lane.b32.xlu0 %v839_v38, %s1215_s21  ;;  %v845_v42 = vmul.f32 %v843_v41, %v839_v38 }
0x1556   :  { %v848_v39 = vpop.permute.xlu0 %847 }
0x1557   :  { %v850_v40 = vmul.f32 %v848_v39, %v839_v38 }
0x1559   :  { %852 = vrot.lane.b32.xlu0 %v850_v40, %s1216_s22 }
0x15cb   :  { %v853_v43 = vpop.permute.xlu0 %852 }
0x15cc   :  { %v855_v44 = vadd.f32 %v853_v43, %v845_v42 }
0x15ce   :  { %1187 = vtanh.f32 %v855_v44 }
0x15d8   :  { %v1188_v45 = vpop.eup %1187 }
0x15d9   :  { %863 = vrot.lane.b32.xlu1 %v1188_v45, %s1215_s21 }
0x15dd   :  { %857 = vrot.lane.b32.xlu1 %v855_v44, %s1217_s23 }
0x164b   :  { %v864_v47 = vpop.permute.xlu1 %863 }
0x164c   :  { %v866_v48 = vmul.f32 %v864_v47, %v839_v38 }
0x164e   :  { %868 = vrot.lane.b32.xlu0 %v866_v48, %s1216_s22  ;;  %s1189_s22 = scalar_lea.vmem %s952_s19, 32 }
0x164f   :  { %v858_v49 = vpop.permute.xlu1 %857  ;;  %p1190_p0 = scmp.ne.s32.totalorder %s952_s19, %s1189_s22  ;;  %p1195_p2 = scmp.lt.s32.totalorder %s1189_s22, %s1189_s22 }
0x1650   :  { %860 = vst.msk [vmem:[#allocation3] sm:$0x3] %vm23_vm1, %v858_v49 }
0x1651   :  { %p1196_p3 = por %p1195_p2, %p1194_p1 }
0x1653   :  { %p1197_p4 = pnand %p1196_p3, %p1190_p0 }
0x16c0   :  { %v869_v50 = vpop.permute.xlu0 %868 }
0x16c1   :  { %871 = vst.msk [vmem:[#allocation2] sm:$0x3] %vm23_vm1, %v869_v50 }
0x16c8   :  { %v875_v51 = vld [vmem:[#allocation2] sm:$0x3] }
0x16c9   :  { %v876_v52 = vpack.c.bf16 %v875_v51, %v875_v51 }
0x16cb   :  { %1098 = vmatmul.mubr.msk.bf16.vlgmr.msra.gmra.mrb[16].mxu0 %vm51_vm2, %v876_v52 }
0x179e   :  { %v937_v1 = vpop.f32.mrb[16].mxu0 }
0x179f   :  { %v938_v54 = vadd.f32 %v998_v53, %v937_v1  ;;  %v1099_v55 = vpop.f32.mrb[17].mxu0 }
0x17a0   :  { %v940_v56 = vpop.f32.mrb[18].mxu0 }
0x17a1   :  { %v1100_v57 = vpop.f32.mrb[19].mxu0  ;;  %944 = vst.msk [vmem:[#allocation4] sm:$0x3] %vm943_vm6, %v938_v54 }
0x17a2   :  { %1200 = shalt.err (!%p1197_p4)
}
0x17a3   :  { %s1201_s3 = scalar_lea.hbm %s1474_s4, 32 }
0x17a4   :  { %p1202_p5 = scmp.ne.s32.totalorder %s1474_s4, %s1201_s3  ;;  %p1205_p6 = scmp.lt.u32.totalorder %s1201_s3, %s1474_s4 }
0x17a6   :  { %p1207_p7 = pnand %p1205_p6, %p1202_p5 }
0x17a8   :  { %1210 = shalt.err (!%p1207_p7)
}
0x17a9   :  { %954 = dma.vmem_to_hbm [thread:$0]  %s952_s19, 32, %s1474_s4, [#allocation5]  }
0x17aa   :  { %1211 = dma.done.wait [#allocation5], 32  }
0x17ab   :  { %1212 = vsyncadd [#allocation5], 4294967264 }
0x17ac   :  { %958 = vsyncpa [#allocation5], 1 }

</bundles_post_ra>
